<compile_context>
chip_gen: v5e
topology: v5e:2x2
jax: 0.10.0
libtpu: 0.0.40
codegen_flags: <defaults>
</compile_context>

<pallas_src>
import math
import functools

import jax
import jax.numpy as jnp
from jax import lax
from jax.experimental import pallas as pl
from jax.experimental.pallas import tpu as pltpu


def _word_embedding_kernel(ids_ref, table_hbm, out_ref, gather_buf, sem, *,
                           tokens_per_block, vocab_size, eps):
    """One grid step gathers + layer-normalizes `tokens_per_block` rows.

    ids_ref    : SMEM (N_pad,) int32  -- scalar-prefetched token ids
    table_hbm  : HBM  (V, H)          -- embedding table (never copied wholesale)
    out_ref    : VMEM (TB, H)         -- this step's output tile
    gather_buf : VMEM (2, TB, H)      -- double-buffered gathered rows
    sem        : DMA semaphores (2,)
    """
    TB = tokens_per_block
    split = pl.program_id(0)            # "parallel" axis (v7x: one pipeline per core)
    inner = pl.program_id(1)            # "arbitrary" axis (carries the double buffer)
    n_inner = pl.num_programs(1)
    blk = split * n_inner + inner        # global token-block index
    slot = lax.rem(inner, 2)

    # Fully unroll tiny loops; partially unroll (8) otherwise so the scalar-heavy
    # id-load/clamp/descriptor-push work co-issues across iterations.
    issue_unroll = True if TB <= 64 else 8

    def start_gather(block_idx, to_slot):
        def body(t, carry):
            tok = ids_ref[block_idx * TB + t]
            tok = jnp.minimum(jnp.maximum(tok, 0), vocab_size - 1)  # clamp OOB ids
            pltpu.make_async_copy(
                table_hbm.at[pl.ds(tok, 1), :],
                gather_buf.at[to_slot, pl.ds(t, 1), :],
                sem.at[to_slot],
            ).start()
            return carry
        lax.fori_loop(0, TB, body, 0, unroll=issue_unroll)

    def wait_gather(from_slot):
        # Single aggregate wait: DMA semaphores count bytes; the TB row copies into
        # this slot signaled exactly TB*H*itemsize bytes, which is what this one
        # (TB, H)-sized descriptor waits for (the src slice is a dummy; no data moves).
        pltpu.make_async_copy(
            table_hbm.at[pl.ds(0, TB), :],
            gather_buf.at[from_slot],
            sem.at[from_slot],
        ).wait()

    # Prime the pipeline on the first block of this split.
    @pl.when(inner == 0)
    def _():
        start_gather(blk, 0)

    # Issue the NEXT block's gather BEFORE blocking so ~2*TB row DMAs are in flight
    # while this block's rows are still landing (hides HBM latency, not just compute).
    # The slot being overwritten was fully consumed in the previous grid step.
    @pl.when(inner + 1 < n_inner)
    def _():
        start_gather(blk + 1, 1 - slot)

    # Block until this step's rows have landed in VMEM.
    wait_gather(slot)

    # Vectorized LayerNorm (no affine) over the whole (TB, H) tile, f32 math.
    # One-pass variance: E[x^2] - mean^2 (two independent cross-lane reductions).
    x = gather_buf[slot].astype(jnp.float32)
    mean = jnp.mean(x, axis=-1, keepdims=True)
    mean_sq = jnp.mean(x * x, axis=-1, keepdims=True)
    var = jnp.maximum(mean_sq - mean * mean, 0.0)
    out_ref[...] = ((x - mean) * lax.rsqrt(var + eps)).astype(out_ref.dtype)
    # Dropout: identity (eval mode).
    # TODO(synk): training-mode dropout (pltpu.prng_* mask) not implemented.


def _round_up(x, m):
    return ((x + m - 1) // m) * m


def word_embedding_forward(input_ids, emb_table, *, eps=1e-12, tokens_per_block=512):
    """JAX wrapper reproducing WordEmbedding.forward (eval mode)."""
    B, S = input_ids.shape
    V, H = emb_table.shape
    N = B * S

    # Token-block size: multiple of 8 (sublanes), big enough to amortize ~0.35us/step,
    # never bigger than the (padded) token count.
    TB = min(_round_up(tokens_per_block, 8), _round_up(N, 8))
    # The aggregate-wait dummy descriptor slices TB table rows, so keep TB <= V
    # (rounded to sublanes) -- always true for realistic vocabularies.
    if V >= 8:
        TB = min(TB, (V // 8) * 8)
    N_pad = _round_up(N, TB)

    total_blocks = N_pad // TB
    # Leading "parallel" axis: on v7x (2 TCs/chip) each core runs its own sequential
    # double-buffered pipeline over half the blocks; on v5e/v6e it is just sequential.
    num_splits = 2 if (total_blocks >= 2 and total_blocks % 2 == 0) else 1
    blocks_per_split = total_blocks // num_splits

    ids_flat = input_ids.reshape(N).astype(jnp.int32)
    if N_pad != N:
        ids_flat = jnp.pad(ids_flat, (0, N_pad - N))     # pad with valid id 0
    # TODO(synk): for very large B*S, stage only the current block's ids into SMEM
    # instead of scalar-prefetching the whole flattened id array (SMEM padding).

    kernel = functools.partial(
        _word_embedding_kernel,
        tokens_per_block=TB, vocab_size=V, eps=eps,
    )

    table_bytes = emb_table.dtype.itemsize
    # Double-buffered gather scratch + double-buffered f32 output tiles + headroom.
    vmem_bytes = 2 * TB * H * table_bytes + 2 * TB * H * 4 + (8 << 20)
    vmem_bytes = int(min(max(vmem_bytes, 32 << 20), 100 << 20))

    cost = pl.CostEstimate(
        flops=7 * N_pad * H,
        transcendentals=N_pad,                           # one rsqrt per row
        bytes_accessed=N_pad * H * table_bytes + N_pad * H * 4 + N_pad * 4,
    )

    out_flat = pl.pallas_call(
        kernel,
        out_shape=jax.ShapeDtypeStruct((N_pad, H), jnp.float32),
        grid_spec=pltpu.PrefetchScalarGridSpec(
            num_scalar_prefetch=1,                       # ids land in SMEM
            grid=(num_splits, blocks_per_split),
            in_specs=[
                pl.BlockSpec(memory_space=pl.ANY),       # table stays in HBM
            ],
            out_specs=pl.BlockSpec(
                (TB, H), lambda s, i, ids: (s * blocks_per_split + i, 0)),
            scratch_shapes=[
                pltpu.VMEM((2, TB, H), emb_table.dtype),  # double-buffered gather scratch
                pltpu.SemaphoreType.DMA((2,)),
            ],
        ),
        compiler_params=pltpu.CompilerParams(
            # outer axis independent (megacore-shardable); inner axis carries the
            # manual double-buffer so it must run sequentially.
            dimension_semantics=("parallel", "arbitrary"),
            vmem_limit_bytes=vmem_bytes,
        ),
        cost_estimate=cost,
    )(ids_flat, emb_table)

    return out_flat[:N].reshape(B, S, H)


def _reference(input_ids, emb_table, eps=1e-12):
    x = emb_table[input_ids]                             # gather
    mean = jnp.mean(x, axis=-1, keepdims=True)
    var = jnp.mean((x - mean) ** 2, axis=-1, keepdims=True)
    return (x - mean) / jnp.sqrt(var + eps)              # dropout = identity (eval)


if __name__ == "__main__":
    # small config consistent with the module
    vocab_size = 64
    hidden_size = 128
    batch, seq = 2, 8
    eps = 1e-12

    key = jax.random.PRNGKey(0)
    k_emb, k_ids = jax.random.split(key)

    # nn.init.trunc_normal_(mean=0, std=std, a=-2*std, b=2*std)
    std = math.sqrt(2.0 / (5.0 * hidden_size))
    emb_table = (
        jax.random.truncated_normal(k_emb, -2.0, 2.0, (vocab_size, hidden_size)) * std
    ).astype(jnp.float32)

    input_ids = jax.random.randint(k_ids, (batch, seq), 0, vocab_size, dtype=jnp.int32)

    out = word_embedding_forward(input_ids, emb_table, eps=eps)
    out = jax.block_until_ready(out)

    ref = _reference(input_ids, emb_table, eps=eps)
    assert out.shape == (batch, seq, hidden_size)
    assert jnp.allclose(out, ref, atol=1e-5, rtol=1e-5), "mismatch vs reference"

    print("KERNEL_OK")
</pallas_src>

<mosaic_0001>
module attributes {stable_mosaic.version = 11 : i64} {
  func.func @_word_embedding_kernel(%arg0: i32, %arg1: i32, %arg2: memref<16xi32, #tpu.memory_space<smem>>, %arg3: memref<64x128xf32, #tpu.memory_space<any>>, %arg4: memref<16x128xf32, #tpu.memory_space<vmem>>, %arg5: memref<2x16x128xf32, #tpu.memory_space<vmem>>, %arg6: memref<2x!tpu.dma_semaphore, #tpu.memory_space<semaphore_mem>>) attributes {dimension_semantics = [#tpu.dimension_semantics<parallel>, #tpu.dimension_semantics<arbitrary>], iteration_bounds = array<i64: 1, 1>, scalar_prefetch = 1 : i64, scratch_operands = 2 : i64, tpu.core_type = #tpu.core_type<tc>, window_params = [{}, {transform_indices = @transform_1, window_bounds = array<i64: 16, 128>}]} {
    %c1_i32 = arith.constant 1 : i32
    %0 = arith.muli %arg0, %c1_i32 : i32
    %1 = arith.addi %0, %arg1 : i32
    %c2_i32 = arith.constant 2 : i32
    %2 = arith.remsi %arg1, %c2_i32 : i32
    %c0_i32 = arith.constant 0 : i32
    %3 = arith.cmpi eq, %arg1, %c0_i32 : i32
    %4 = arith.extui %3 : i1 to i32
    %c0_i32_0 = arith.constant 0 : i32
    %5 = arith.cmpi ne, %4, %c0_i32_0 : i32
    scf.if %5 {
      %c0_i32_16 = arith.constant 0 : i32
      %c16_i32 = arith.constant 16 : i32
      %39 = arith.muli %1, %c16_i32 : i32
      %40 = arith.addi %39, %c0_i32_16 : i32
      %41 = arith.index_cast %40 : i32 to index
      %42 = memref.load %arg2[%41] : memref<16xi32, #tpu.memory_space<smem>>
      %c0_i32_17 = arith.constant 0 : i32
      %43 = arith.maxsi %42, %c0_i32_17 : i32
      %c63_i32 = arith.constant 63 : i32
      %44 = arith.minsi %43, %c63_i32 : i32
      %c0_i32_18 = arith.constant 0 : i32
      %c0_i32_19 = arith.constant 0 : i32
      %c0_i32_20 = arith.constant 0 : i32
      %45 = tpu.memref_slice %arg3[%44, %c0_i32_20] : memref<64x128xf32, #tpu.memory_space<any>> -> memref<1x128xf32, #tpu.memory_space<any>>
      %c0_i32_21 = arith.constant 0 : i32
      %46 = tpu.memref_slice %arg5[%c0_i32_18, %c0_i32_16, %c0_i32_21] : memref<2x16x128xf32, #tpu.memory_space<vmem>> -> memref<1x1x128xf32, #tpu.memory_space<vmem>>
      %47 = tpu.memref_squeeze %46 : memref<1x1x128xf32, #tpu.memory_space<vmem>> -> memref<1x128xf32, #tpu.memory_space<vmem>>
      %48 = tpu.memref_slice %arg6[%c0_i32_19] : memref<2x!tpu.dma_semaphore, #tpu.memory_space<semaphore_mem>> -> memref<1x!tpu.dma_semaphore, #tpu.memory_space<semaphore_mem>>
      %49 = tpu.memref_squeeze %48 : memref<1x!tpu.dma_semaphore, #tpu.memory_space<semaphore_mem>> -> memref<!tpu.dma_semaphore, #tpu.memory_space<semaphore_mem>>
      tpu.enqueue_dma source(%45 : memref<1x128xf32, #tpu.memory_space<any>>) target(%47 : memref<1x128xf32, #tpu.memory_space<vmem>>) target_semaphore(%49 : memref<!tpu.dma_semaphore, #tpu.memory_space<semaphore_mem>>)
      %c1_i32_22 = arith.constant 1 : i32
      %c16_i32_23 = arith.constant 16 : i32
      %50 = arith.muli %1, %c16_i32_23 : i32
      %51 = arith.addi %50, %c1_i32_22 : i32
      %52 = arith.index_cast %51 : i32 to index
      %53 = memref.load %arg2[%52] : memref<16xi32, #tpu.memory_space<smem>>
      %c0_i32_24 = arith.constant 0 : i32
      %54 = arith.maxsi %53, %c0_i32_24 : i32
      %c63_i32_25 = arith.constant 63 : i32
      %55 = arith.minsi %54, %c63_i32_25 : i32
      %c0_i32_26 = arith.constant 0 : i32
      %c0_i32_27 = arith.constant 0 : i32
      %c0_i32_28 = arith.constant 0 : i32
      %56 = tpu.memref_slice %arg3[%55, %c0_i32_28] : memref<64x128xf32, #tpu.memory_space<any>> -> memref<1x128xf32, #tpu.memory_space<any>>
      %c0_i32_29 = arith.constant 0 : i32
      %57 = tpu.memref_slice %arg5[%c0_i32_26, %c1_i32_22, %c0_i32_29] : memref<2x16x128xf32, #tpu.memory_space<vmem>> -> memref<1x1x128xf32, #tpu.memory_space<vmem>>
      %58 = tpu.memref_squeeze %57 : memref<1x1x128xf32, #tpu.memory_space<vmem>> -> memref<1x128xf32, #tpu.memory_space<vmem>>
      %59 = tpu.memref_slice %arg6[%c0_i32_27] : memref<2x!tpu.dma_semaphore, #tpu.memory_space<semaphore_mem>> -> memref<1x!tpu.dma_semaphore, #tpu.memory_space<semaphore_mem>>
      %60 = tpu.memref_squeeze %59 : memref<1x!tpu.dma_semaphore, #tpu.memory_space<semaphore_mem>> -> memref<!tpu.dma_semaphore, #tpu.memory_space<semaphore_mem>>
      tpu.enqueue_dma source(%56 : memref<1x128xf32, #tpu.memory_space<any>>) target(%58 : memref<1x128xf32, #tpu.memory_space<vmem>>) target_semaphore(%60 : memref<!tpu.dma_semaphore, #tpu.memory_space<semaphore_mem>>)
      %c2_i32_30 = arith.constant 2 : i32
      %c16_i32_31 = arith.constant 16 : i32
      %61 = arith.muli %1, %c16_i32_31 : i32
      %62 = arith.addi %61, %c2_i32_30 : i32
      %63 = arith.index_cast %62 : i32 to index
      %64 = memref.load %arg2[%63] : memref<16xi32, #tpu.memory_space<smem>>
      %c0_i32_32 = arith.constant 0 : i32
      %65 = arith.maxsi %64, %c0_i32_32 : i32
      %c63_i32_33 = arith.constant 63 : i32
      %66 = arith.minsi %65, %c63_i32_33 : i32
      %c0_i32_34 = arith.constant 0 : i32
      %c0_i32_35 = arith.constant 0 : i32
      %c0_i32_36 = arith.constant 0 : i32
      %67 = tpu.memref_slice %arg3[%66, %c0_i32_36] : memref<64x128xf32, #tpu.memory_space<any>> -> memref<1x128xf32, #tpu.memory_space<any>>
      %c0_i32_37 = arith.constant 0 : i32
      %68 = tpu.memref_slice %arg5[%c0_i32_34, %c2_i32_30, %c0_i32_37] : memref<2x16x128xf32, #tpu.memory_space<vmem>> -> memref<1x1x128xf32, #tpu.memory_space<vmem>>
      %69 = tpu.memref_squeeze %68 : memref<1x1x128xf32, #tpu.memory_space<vmem>> -> memref<1x128xf32, #tpu.memory_space<vmem>>
      %70 = tpu.memref_slice %arg6[%c0_i32_35] : memref<2x!tpu.dma_semaphore, #tpu.memory_space<semaphore_mem>> -> memref<1x!tpu.dma_semaphore, #tpu.memory_space<semaphore_mem>>
      %71 = tpu.memref_squeeze %70 : memref<1x!tpu.dma_semaphore, #tpu.memory_space<semaphore_mem>> -> memref<!tpu.dma_semaphore, #tpu.memory_space<semaphore_mem>>
      tpu.enqueue_dma source(%67 : memref<1x128xf32, #tpu.memory_space<any>>) target(%69 : memref<1x128xf32, #tpu.memory_space<vmem>>) target_semaphore(%71 : memref<!tpu.dma_semaphore, #tpu.memory_space<semaphore_mem>>)
      %c3_i32 = arith.constant 3 : i32
      %c16_i32_38 = arith.constant 16 : i32
      %72 = arith.muli %1, %c16_i32_38 : i32
      %73 = arith.addi %72, %c3_i32 : i32
      %74 = arith.index_cast %73 : i32 to index
      %75 = memref.load %arg2[%74] : memref<16xi32, #tpu.memory_space<smem>>
      %c0_i32_39 = arith.constant 0 : i32
      %76 = arith.maxsi %75, %c0_i32_39 : i32
      %c63_i32_40 = arith.constant 63 : i32
      %77 = arith.minsi %76, %c63_i32_40 : i32
      %c0_i32_41 = arith.constant 0 : i32
      %c0_i32_42 = arith.constant 0 : i32
      %c0_i32_43 = arith.constant 0 : i32
      %78 = tpu.memref_slice %arg3[%77, %c0_i32_43] : memref<64x128xf32, #tpu.memory_space<any>> -> memref<1x128xf32, #tpu.memory_space<any>>
      %c0_i32_44 = arith.constant 0 : i32
      %79 = tpu.memref_slice %arg5[%c0_i32_41, %c3_i32, %c0_i32_44] : memref<2x16x128xf32, #tpu.memory_space<vmem>> -> memref<1x1x128xf32, #tpu.memory_space<vmem>>
      %80 = tpu.memref_squeeze %79 : memref<1x1x128xf32, #tpu.memory_space<vmem>> -> memref<1x128xf32, #tpu.memory_space<vmem>>
      %81 = tpu.memref_slice %arg6[%c0_i32_42] : memref<2x!tpu.dma_semaphore, #tpu.memory_space<semaphore_mem>> -> memref<1x!tpu.dma_semaphore, #tpu.memory_space<semaphore_mem>>
      %82 = tpu.memref_squeeze %81 : memref<1x!tpu.dma_semaphore, #tpu.memory_space<semaphore_mem>> -> memref<!tpu.dma_semaphore, #tpu.memory_space<semaphore_mem>>
      tpu.enqueue_dma source(%78 : memref<1x128xf32, #tpu.memory_space<any>>) target(%80 : memref<1x128xf32, #tpu.memory_space<vmem>>) target_semaphore(%82 : memref<!tpu.dma_semaphore, #tpu.memory_space<semaphore_mem>>)
      %c4_i32 = arith.constant 4 : i32
      %c16_i32_45 = arith.constant 16 : i32
      %83 = arith.muli %1, %c16_i32_45 : i32
      %84 = arith.addi %83, %c4_i32 : i32
      %85 = arith.index_cast %84 : i32 to index
      %86 = memref.load %arg2[%85] : memref<16xi32, #tpu.memory_space<smem>>
      %c0_i32_46 = arith.constant 0 : i32
      %87 = arith.maxsi %86, %c0_i32_46 : i32
      %c63_i32_47 = arith.constant 63 : i32
      %88 = arith.minsi %87, %c63_i32_47 : i32
      %c0_i32_48 = arith.constant 0 : i32
      %c0_i32_49 = arith.constant 0 : i32
      %c0_i32_50 = arith.constant 0 : i32
      %89 = tpu.memref_slice %arg3[%88, %c0_i32_50] : memref<64x128xf32, #tpu.memory_space<any>> -> memref<1x128xf32, #tpu.memory_space<any>>
      %c0_i32_51 = arith.constant 0 : i32
      %90 = tpu.memref_slice %arg5[%c0_i32_48, %c4_i32, %c0_i32_51] : memref<2x16x128xf32, #tpu.memory_space<vmem>> -> memref<1x1x128xf32, #tpu.memory_space<vmem>>
      %91 = tpu.memref_squeeze %90 : memref<1x1x128xf32, #tpu.memory_space<vmem>> -> memref<1x128xf32, #tpu.memory_space<vmem>>
      %92 = tpu.memref_slice %arg6[%c0_i32_49] : memref<2x!tpu.dma_semaphore, #tpu.memory_space<semaphore_mem>> -> memref<1x!tpu.dma_semaphore, #tpu.memory_space<semaphore_mem>>
      %93 = tpu.memref_squeeze %92 : memref<1x!tpu.dma_semaphore, #tpu.memory_space<semaphore_mem>> -> memref<!tpu.dma_semaphore, #tpu.memory_space<semaphore_mem>>
      tpu.enqueue_dma source(%89 : memref<1x128xf32, #tpu.memory_space<any>>) target(%91 : memref<1x128xf32, #tpu.memory_space<vmem>>) target_semaphore(%93 : memref<!tpu.dma_semaphore, #tpu.memory_space<semaphore_mem>>)
      %c5_i32 = arith.constant 5 : i32
      %c16_i32_52 = arith.constant 16 : i32
      %94 = arith.muli %1, %c16_i32_52 : i32
      %95 = arith.addi %94, %c5_i32 : i32
      %96 = arith.index_cast %95 : i32 to index
      %97 = memref.load %arg2[%96] : memref<16xi32, #tpu.memory_space<smem>>
      %c0_i32_53 = arith.constant 0 : i32
      %98 = arith.maxsi %97, %c0_i32_53 : i32
      %c63_i32_54 = arith.constant 63 : i32
      %99 = arith.minsi %98, %c63_i32_54 : i32
      %c0_i32_55 = arith.constant 0 : i32
      %c0_i32_56 = arith.constant 0 : i32
      %c0_i32_57 = arith.constant 0 : i32
      %100 = tpu.memref_slice %arg3[%99, %c0_i32_57] : memref<64x128xf32, #tpu.memory_space<any>> -> memref<1x128xf32, #tpu.memory_space<any>>
      %c0_i32_58 = arith.constant 0 : i32
      %101 = tpu.memref_slice %arg5[%c0_i32_55, %c5_i32, %c0_i32_58] : memref<2x16x128xf32, #tpu.memory_space<vmem>> -> memref<1x1x128xf32, #tpu.memory_space<vmem>>
      %102 = tpu.memref_squeeze %101 : memref<1x1x128xf32, #tpu.memory_space<vmem>> -> memref<1x128xf32, #tpu.memory_space<vmem>>
      %103 = tpu.memref_slice %arg6[%c0_i32_56] : memref<2x!tpu.dma_semaphore, #tpu.memory_space<semaphore_mem>> -> memref<1x!tpu.dma_semaphore, #tpu.memory_space<semaphore_mem>>
      %104 = tpu.memref_squeeze %103 : memref<1x!tpu.dma_semaphore, #tpu.memory_space<semaphore_mem>> -> memref<!tpu.dma_semaphore, #tpu.memory_space<semaphore_mem>>
      tpu.enqueue_dma source(%100 : memref<1x128xf32, #tpu.memory_space<any>>) target(%102 : memref<1x128xf32, #tpu.memory_space<vmem>>) target_semaphore(%104 : memref<!tpu.dma_semaphore, #tpu.memory_space<semaphore_mem>>)
      %c6_i32 = arith.constant 6 : i32
      %c16_i32_59 = arith.constant 16 : i32
      %105 = arith.muli %1, %c16_i32_59 : i32
      %106 = arith.addi %105, %c6_i32 : i32
      %107 = arith.index_cast %106 : i32 to index
      %108 = memref.load %arg2[%107] : memref<16xi32, #tpu.memory_space<smem>>
      %c0_i32_60 = arith.constant 0 : i32
      %109 = arith.maxsi %108, %c0_i32_60 : i32
      %c63_i32_61 = arith.constant 63 : i32
      %110 = arith.minsi %109, %c63_i32_61 : i32
      %c0_i32_62 = arith.constant 0 : i32
      %c0_i32_63 = arith.constant 0 : i32
      %c0_i32_64 = arith.constant 0 : i32
      %111 = tpu.memref_slice %arg3[%110, %c0_i32_64] : memref<64x128xf32, #tpu.memory_space<any>> -> memref<1x128xf32, #tpu.memory_space<any>>
      %c0_i32_65 = arith.constant 0 : i32
      %112 = tpu.memref_slice %arg5[%c0_i32_62, %c6_i32, %c0_i32_65] : memref<2x16x128xf32, #tpu.memory_space<vmem>> -> memref<1x1x128xf32, #tpu.memory_space<vmem>>
      %113 = tpu.memref_squeeze %112 : memref<1x1x128xf32, #tpu.memory_space<vmem>> -> memref<1x128xf32, #tpu.memory_space<vmem>>
      %114 = tpu.memref_slice %arg6[%c0_i32_63] : memref<2x!tpu.dma_semaphore, #tpu.memory_space<semaphore_mem>> -> memref<1x!tpu.dma_semaphore, #tpu.memory_space<semaphore_mem>>
      %115 = tpu.memref_squeeze %114 : memref<1x!tpu.dma_semaphore, #tpu.memory_space<semaphore_mem>> -> memref<!tpu.dma_semaphore, #tpu.memory_space<semaphore_mem>>
      tpu.enqueue_dma source(%111 : memref<1x128xf32, #tpu.memory_space<any>>) target(%113 : memref<1x128xf32, #tpu.memory_space<vmem>>) target_semaphore(%115 : memref<!tpu.dma_semaphore, #tpu.memory_space<semaphore_mem>>)
      %c7_i32 = arith.constant 7 : i32
      %c16_i32_66 = arith.constant 16 : i32
      %116 = arith.muli %1, %c16_i32_66 : i32
      %117 = arith.addi %116, %c7_i32 : i32
      %118 = arith.index_cast %117 : i32 to index
      %119 = memref.load %arg2[%118] : memref<16xi32, #tpu.memory_space<smem>>
      %c0_i32_67 = arith.constant 0 : i32
      %120 = arith.maxsi %119, %c0_i32_67 : i32
      %c63_i32_68 = arith.constant 63 : i32
      %121 = arith.minsi %120, %c63_i32_68 : i32
      %c0_i32_69 = arith.constant 0 : i32
      %c0_i32_70 = arith.constant 0 : i32
      %c0_i32_71 = arith.constant 0 : i32
      %122 = tpu.memref_slice %arg3[%121, %c0_i32_71] : memref<64x128xf32, #tpu.memory_space<any>> -> memref<1x128xf32, #tpu.memory_space<any>>
      %c0_i32_72 = arith.constant 0 : i32
      %123 = tpu.memref_slice %arg5[%c0_i32_69, %c7_i32, %c0_i32_72] : memref<2x16x128xf32, #tpu.memory_space<vmem>> -> memref<1x1x128xf32, #tpu.memory_space<vmem>>
      %124 = tpu.memref_squeeze %123 : memref<1x1x128xf32, #tpu.memory_space<vmem>> -> memref<1x128xf32, #tpu.memory_space<vmem>>
      %125 = tpu.memref_slice %arg6[%c0_i32_70] : memref<2x!tpu.dma_semaphore, #tpu.memory_space<semaphore_mem>> -> memref<1x!tpu.dma_semaphore, #tpu.memory_space<semaphore_mem>>
      %126 = tpu.memref_squeeze %125 : memref<1x!tpu.dma_semaphore, #tpu.memory_space<semaphore_mem>> -> memref<!tpu.dma_semaphore, #tpu.memory_space<semaphore_mem>>
      tpu.enqueue_dma source(%122 : memref<1x128xf32, #tpu.memory_space<any>>) target(%124 : memref<1x128xf32, #tpu.memory_space<vmem>>) target_semaphore(%126 : memref<!tpu.dma_semaphore, #tpu.memory_space<semaphore_mem>>)
      %c8_i32 = arith.constant 8 : i32
      %c16_i32_73 = arith.constant 16 : i32
      %127 = arith.muli %1, %c16_i32_73 : i32
      %128 = arith.addi %127, %c8_i32 : i32
      %129 = arith.index_cast %128 : i32 to index
      %130 = memref.load %arg2[%129] : memref<16xi32, #tpu.memory_space<smem>>
      %c0_i32_74 = arith.constant 0 : i32
      %131 = arith.maxsi %130, %c0_i32_74 : i32
      %c63_i32_75 = arith.constant 63 : i32
      %132 = arith.minsi %131, %c63_i32_75 : i32
      %c0_i32_76 = arith.constant 0 : i32
      %c0_i32_77 = arith.constant 0 : i32
      %c0_i32_78 = arith.constant 0 : i32
      %133 = tpu.memref_slice %arg3[%132, %c0_i32_78] : memref<64x128xf32, #tpu.memory_space<any>> -> memref<1x128xf32, #tpu.memory_space<any>>
      %c0_i32_79 = arith.constant 0 : i32
      %134 = tpu.memref_slice %arg5[%c0_i32_76, %c8_i32, %c0_i32_79] : memref<2x16x128xf32, #tpu.memory_space<vmem>> -> memref<1x1x128xf32, #tpu.memory_space<vmem>>
      %135 = tpu.memref_squeeze %134 : memref<1x1x128xf32, #tpu.memory_space<vmem>> -> memref<1x128xf32, #tpu.memory_space<vmem>>
      %136 = tpu.memref_slice %arg6[%c0_i32_77] : memref<2x!tpu.dma_semaphore, #tpu.memory_space<semaphore_mem>> -> memref<1x!tpu.dma_semaphore, #tpu.memory_space<semaphore_mem>>
      %137 = tpu.memref_squeeze %136 : memref<1x!tpu.dma_semaphore, #tpu.memory_space<semaphore_mem>> -> memref<!tpu.dma_semaphore, #tpu.memory_space<semaphore_mem>>
      tpu.enqueue_dma source(%133 : memref<1x128xf32, #tpu.memory_space<any>>) target(%135 : memref<1x128xf32, #tpu.memory_space<vmem>>) target_semaphore(%137 : memref<!tpu.dma_semaphore, #tpu.memory_space<semaphore_mem>>)
      %c9_i32 = arith.constant 9 : i32
      %c16_i32_80 = arith.constant 16 : i32
      %138 = arith.muli %1, %c16_i32_80 : i32
      %139 = arith.addi %138, %c9_i32 : i32
      %140 = arith.index_cast %139 : i32 to index
      %141 = memref.load %arg2[%140] : memref<16xi32, #tpu.memory_space<smem>>
      %c0_i32_81 = arith.constant 0 : i32
      %142 = arith.maxsi %141, %c0_i32_81 : i32
      %c63_i32_82 = arith.constant 63 : i32
      %143 = arith.minsi %142, %c63_i32_82 : i32
      %c0_i32_83 = arith.constant 0 : i32
      %c0_i32_84 = arith.constant 0 : i32
      %c0_i32_85 = arith.constant 0 : i32
      %144 = tpu.memref_slice %arg3[%143, %c0_i32_85] : memref<64x128xf32, #tpu.memory_space<any>> -> memref<1x128xf32, #tpu.memory_space<any>>
      %c0_i32_86 = arith.constant 0 : i32
      %145 = tpu.memref_slice %arg5[%c0_i32_83, %c9_i32, %c0_i32_86] : memref<2x16x128xf32, #tpu.memory_space<vmem>> -> memref<1x1x128xf32, #tpu.memory_space<vmem>>
      %146 = tpu.memref_squeeze %145 : memref<1x1x128xf32, #tpu.memory_space<vmem>> -> memref<1x128xf32, #tpu.memory_space<vmem>>
      %147 = tpu.memref_slice %arg6[%c0_i32_84] : memref<2x!tpu.dma_semaphore, #tpu.memory_space<semaphore_mem>> -> memref<1x!tpu.dma_semaphore, #tpu.memory_space<semaphore_mem>>
      %148 = tpu.memref_squeeze %147 : memref<1x!tpu.dma_semaphore, #tpu.memory_space<semaphore_mem>> -> memref<!tpu.dma_semaphore, #tpu.memory_space<semaphore_mem>>
      tpu.enqueue_dma source(%144 : memref<1x128xf32, #tpu.memory_space<any>>) target(%146 : memref<1x128xf32, #tpu.memory_space<vmem>>) target_semaphore(%148 : memref<!tpu.dma_semaphore, #tpu.memory_space<semaphore_mem>>)
      %c10_i32 = arith.constant 10 : i32
      %c16_i32_87 = arith.constant 16 : i32
      %149 = arith.muli %1, %c16_i32_87 : i32
      %150 = arith.addi %149, %c10_i32 : i32
      %151 = arith.index_cast %150 : i32 to index
      %152 = memref.load %arg2[%151] : memref<16xi32, #tpu.memory_space<smem>>
      %c0_i32_88 = arith.constant 0 : i32
      %153 = arith.maxsi %152, %c0_i32_88 : i32
      %c63_i32_89 = arith.constant 63 : i32
      %154 = arith.minsi %153, %c63_i32_89 : i32
      %c0_i32_90 = arith.constant 0 : i32
      %c0_i32_91 = arith.constant 0 : i32
      %c0_i32_92 = arith.constant 0 : i32
      %155 = tpu.memref_slice %arg3[%154, %c0_i32_92] : memref<64x128xf32, #tpu.memory_space<any>> -> memref<1x128xf32, #tpu.memory_space<any>>
      %c0_i32_93 = arith.constant 0 : i32
      %156 = tpu.memref_slice %arg5[%c0_i32_90, %c10_i32, %c0_i32_93] : memref<2x16x128xf32, #tpu.memory_space<vmem>> -> memref<1x1x128xf32, #tpu.memory_space<vmem>>
      %157 = tpu.memref_squeeze %156 : memref<1x1x128xf32, #tpu.memory_space<vmem>> -> memref<1x128xf32, #tpu.memory_space<vmem>>
      %158 = tpu.memref_slice %arg6[%c0_i32_91] : memref<2x!tpu.dma_semaphore, #tpu.memory_space<semaphore_mem>> -> memref<1x!tpu.dma_semaphore, #tpu.memory_space<semaphore_mem>>
      %159 = tpu.memref_squeeze %158 : memref<1x!tpu.dma_semaphore, #tpu.memory_space<semaphore_mem>> -> memref<!tpu.dma_semaphore, #tpu.memory_space<semaphore_mem>>
      tpu.enqueue_dma source(%155 : memref<1x128xf32, #tpu.memory_space<any>>) target(%157 : memref<1x128xf32, #tpu.memory_space<vmem>>) target_semaphore(%159 : memref<!tpu.dma_semaphore, #tpu.memory_space<semaphore_mem>>)
      %c11_i32 = arith.constant 11 : i32
      %c16_i32_94 = arith.constant 16 : i32
      %160 = arith.muli %1, %c16_i32_94 : i32
      %161 = arith.addi %160, %c11_i32 : i32
      %162 = arith.index_cast %161 : i32 to index
      %163 = memref.load %arg2[%162] : memref<16xi32, #tpu.memory_space<smem>>
      %c0_i32_95 = arith.constant 0 : i32
      %164 = arith.maxsi %163, %c0_i32_95 : i32
      %c63_i32_96 = arith.constant 63 : i32
      %165 = arith.minsi %164, %c63_i32_96 : i32
      %c0_i32_97 = arith.constant 0 : i32
      %c0_i32_98 = arith.constant 0 : i32
      %c0_i32_99 = arith.constant 0 : i32
      %166 = tpu.memref_slice %arg3[%165, %c0_i32_99] : memref<64x128xf32, #tpu.memory_space<any>> -> memref<1x128xf32, #tpu.memory_space<any>>
      %c0_i32_100 = arith.constant 0 : i32
      %167 = tpu.memref_slice %arg5[%c0_i32_97, %c11_i32, %c0_i32_100] : memref<2x16x128xf32, #tpu.memory_space<vmem>> -> memref<1x1x128xf32, #tpu.memory_space<vmem>>
      %168 = tpu.memref_squeeze %167 : memref<1x1x128xf32, #tpu.memory_space<vmem>> -> memref<1x128xf32, #tpu.memory_space<vmem>>
      %169 = tpu.memref_slice %arg6[%c0_i32_98] : memref<2x!tpu.dma_semaphore, #tpu.memory_space<semaphore_mem>> -> memref<1x!tpu.dma_semaphore, #tpu.memory_space<semaphore_mem>>
      %170 = tpu.memref_squeeze %169 : memref<1x!tpu.dma_semaphore, #tpu.memory_space<semaphore_mem>> -> memref<!tpu.dma_semaphore, #tpu.memory_space<semaphore_mem>>
      tpu.enqueue_dma source(%166 : memref<1x128xf32, #tpu.memory_space<any>>) target(%168 : memref<1x128xf32, #tpu.memory_space<vmem>>) target_semaphore(%170 : memref<!tpu.dma_semaphore, #tpu.memory_space<semaphore_mem>>)
      %c12_i32 = arith.constant 12 : i32
      %c16_i32_101 = arith.constant 16 : i32
      %171 = arith.muli %1, %c16_i32_101 : i32
      %172 = arith.addi %171, %c12_i32 : i32
      %173 = arith.index_cast %172 : i32 to index
      %174 = memref.load %arg2[%173] : memref<16xi32, #tpu.memory_space<smem>>
      %c0_i32_102 = arith.constant 0 : i32
      %175 = arith.maxsi %174, %c0_i32_102 : i32
      %c63_i32_103 = arith.constant 63 : i32
      %176 = arith.minsi %175, %c63_i32_103 : i32
      %c0_i32_104 = arith.constant 0 : i32
      %c0_i32_105 = arith.constant 0 : i32
      %c0_i32_106 = arith.constant 0 : i32
      %177 = tpu.memref_slice %arg3[%176, %c0_i32_106] : memref<64x128xf32, #tpu.memory_space<any>> -> memref<1x128xf32, #tpu.memory_space<any>>
      %c0_i32_107 = arith.constant 0 : i32
      %178 = tpu.memref_slice %arg5[%c0_i32_104, %c12_i32, %c0_i32_107] : memref<2x16x128xf32, #tpu.memory_space<vmem>> -> memref<1x1x128xf32, #tpu.memory_space<vmem>>
      %179 = tpu.memref_squeeze %178 : memref<1x1x128xf32, #tpu.memory_space<vmem>> -> memref<1x128xf32, #tpu.memory_space<vmem>>
      %180 = tpu.memref_slice %arg6[%c0_i32_105] : memref<2x!tpu.dma_semaphore, #tpu.memory_space<semaphore_mem>> -> memref<1x!tpu.dma_semaphore, #tpu.memory_space<semaphore_mem>>
      %181 = tpu.memref_squeeze %180 : memref<1x!tpu.dma_semaphore, #tpu.memory_space<semaphore_mem>> -> memref<!tpu.dma_semaphore, #tpu.memory_space<semaphore_mem>>
      tpu.enqueue_dma source(%177 : memref<1x128xf32, #tpu.memory_space<any>>) target(%179 : memref<1x128xf32, #tpu.memory_space<vmem>>) target_semaphore(%181 : memref<!tpu.dma_semaphore, #tpu.memory_space<semaphore_mem>>)
      %c13_i32 = arith.constant 13 : i32
      %c16_i32_108 = arith.constant 16 : i32
      %182 = arith.muli %1, %c16_i32_108 : i32
      %183 = arith.addi %182, %c13_i32 : i32
      %184 = arith.index_cast %183 : i32 to index
      %185 = memref.load %arg2[%184] : memref<16xi32, #tpu.memory_space<smem>>
      %c0_i32_109 = arith.constant 0 : i32
      %186 = arith.maxsi %185, %c0_i32_109 : i32
      %c63_i32_110 = arith.constant 63 : i32
      %187 = arith.minsi %186, %c63_i32_110 : i32
      %c0_i32_111 = arith.constant 0 : i32
      %c0_i32_112 = arith.constant 0 : i32
      %c0_i32_113 = arith.constant 0 : i32
      %188 = tpu.memref_slice %arg3[%187, %c0_i32_113] : memref<64x128xf32, #tpu.memory_space<any>> -> memref<1x128xf32, #tpu.memory_space<any>>
      %c0_i32_114 = arith.constant 0 : i32
      %189 = tpu.memref_slice %arg5[%c0_i32_111, %c13_i32, %c0_i32_114] : memref<2x16x128xf32, #tpu.memory_space<vmem>> -> memref<1x1x128xf32, #tpu.memory_space<vmem>>
      %190 = tpu.memref_squeeze %189 : memref<1x1x128xf32, #tpu.memory_space<vmem>> -> memref<1x128xf32, #tpu.memory_space<vmem>>
      %191 = tpu.memref_slice %arg6[%c0_i32_112] : memref<2x!tpu.dma_semaphore, #tpu.memory_space<semaphore_mem>> -> memref<1x!tpu.dma_semaphore, #tpu.memory_space<semaphore_mem>>
      %192 = tpu.memref_squeeze %191 : memref<1x!tpu.dma_semaphore, #tpu.memory_space<semaphore_mem>> -> memref<!tpu.dma_semaphore, #tpu.memory_space<semaphore_mem>>
      tpu.enqueue_dma source(%188 : memref<1x128xf32, #tpu.memory_space<any>>) target(%190 : memref<1x128xf32, #tpu.memory_space<vmem>>) target_semaphore(%192 : memref<!tpu.dma_semaphore, #tpu.memory_space<semaphore_mem>>)
      %c14_i32 = arith.constant 14 : i32
      %c16_i32_115 = arith.constant 16 : i32
      %193 = arith.muli %1, %c16_i32_115 : i32
      %194 = arith.addi %193, %c14_i32 : i32
      %195 = arith.index_cast %194 : i32 to index
      %196 = memref.load %arg2[%195] : memref<16xi32, #tpu.memory_space<smem>>
      %c0_i32_116 = arith.constant 0 : i32
      %197 = arith.maxsi %196, %c0_i32_116 : i32
      %c63_i32_117 = arith.constant 63 : i32
      %198 = arith.minsi %197, %c63_i32_117 : i32
      %c0_i32_118 = arith.constant 0 : i32
      %c0_i32_119 = arith.constant 0 : i32
      %c0_i32_120 = arith.constant 0 : i32
      %199 = tpu.memref_slice %arg3[%198, %c0_i32_120] : memref<64x128xf32, #tpu.memory_space<any>> -> memref<1x128xf32, #tpu.memory_space<any>>
      %c0_i32_121 = arith.constant 0 : i32
      %200 = tpu.memref_slice %arg5[%c0_i32_118, %c14_i32, %c0_i32_121] : memref<2x16x128xf32, #tpu.memory_space<vmem>> -> memref<1x1x128xf32, #tpu.memory_space<vmem>>
      %201 = tpu.memref_squeeze %200 : memref<1x1x128xf32, #tpu.memory_space<vmem>> -> memref<1x128xf32, #tpu.memory_space<vmem>>
      %202 = tpu.memref_slice %arg6[%c0_i32_119] : memref<2x!tpu.dma_semaphore, #tpu.memory_space<semaphore_mem>> -> memref<1x!tpu.dma_semaphore, #tpu.memory_space<semaphore_mem>>
      %203 = tpu.memref_squeeze %202 : memref<1x!tpu.dma_semaphore, #tpu.memory_space<semaphore_mem>> -> memref<!tpu.dma_semaphore, #tpu.memory_space<semaphore_mem>>
      tpu.enqueue_dma source(%199 : memref<1x128xf32, #tpu.memory_space<any>>) target(%201 : memref<1x128xf32, #tpu.memory_space<vmem>>) target_semaphore(%203 : memref<!tpu.dma_semaphore, #tpu.memory_space<semaphore_mem>>)
      %c15_i32 = arith.constant 15 : i32
      %c16_i32_122 = arith.constant 16 : i32
      %204 = arith.muli %1, %c16_i32_122 : i32
      %205 = arith.addi %204, %c15_i32 : i32
      %206 = arith.index_cast %205 : i32 to index
      %207 = memref.load %arg2[%206] : memref<16xi32, #tpu.memory_space<smem>>
      %c0_i32_123 = arith.constant 0 : i32
      %208 = arith.maxsi %207, %c0_i32_123 : i32
      %c63_i32_124 = arith.constant 63 : i32
      %209 = arith.minsi %208, %c63_i32_124 : i32
      %c0_i32_125 = arith.constant 0 : i32
      %c0_i32_126 = arith.constant 0 : i32
      %c0_i32_127 = arith.constant 0 : i32
      %210 = tpu.memref_slice %arg3[%209, %c0_i32_127] : memref<64x128xf32, #tpu.memory_space<any>> -> memref<1x128xf32, #tpu.memory_space<any>>
      %c0_i32_128 = arith.constant 0 : i32
      %211 = tpu.memref_slice %arg5[%c0_i32_125, %c15_i32, %c0_i32_128] : memref<2x16x128xf32, #tpu.memory_space<vmem>> -> memref<1x1x128xf32, #tpu.memory_space<vmem>>
      %212 = tpu.memref_squeeze %211 : memref<1x1x128xf32, #tpu.memory_space<vmem>> -> memref<1x128xf32, #tpu.memory_space<vmem>>
      %213 = tpu.memref_slice %arg6[%c0_i32_126] : memref<2x!tpu.dma_semaphore, #tpu.memory_space<semaphore_mem>> -> memref<1x!tpu.dma_semaphore, #tpu.memory_space<semaphore_mem>>
      %214 = tpu.memref_squeeze %213 : memref<1x!tpu.dma_semaphore, #tpu.memory_space<semaphore_mem>> -> memref<!tpu.dma_semaphore, #tpu.memory_space<semaphore_mem>>
      tpu.enqueue_dma source(%210 : memref<1x128xf32, #tpu.memory_space<any>>) target(%212 : memref<1x128xf32, #tpu.memory_space<vmem>>) target_semaphore(%214 : memref<!tpu.dma_semaphore, #tpu.memory_space<semaphore_mem>>)
      %c16_i32_129 = arith.constant 16 : i32
    } else {
    }
    %c1_i32_1 = arith.constant 1 : i32
    %6 = arith.addi %arg1, %c1_i32_1 : i32
    %c1_i32_2 = arith.constant 1 : i32
    %7 = arith.cmpi slt, %6, %c1_i32_2 : i32
    %8 = arith.extui %7 : i1 to i32
    %c0_i32_3 = arith.constant 0 : i32
    %9 = arith.cmpi ne, %8, %c0_i32_3 : i32
    scf.if %9 {
      %c1_i32_16 = arith.constant 1 : i32
      %39 = arith.addi %1, %c1_i32_16 : i32
      %c1_i32_17 = arith.constant 1 : i32
      %40 = arith.subi %c1_i32_17, %2 : i32
      %c0_i32_18 = arith.constant 0 : i32
      %c16_i32 = arith.constant 16 : i32
      %41 = arith.muli %39, %c16_i32 : i32
      %42 = arith.addi %41, %c0_i32_18 : i32
      %43 = arith.index_cast %42 : i32 to index
      %44 = memref.load %arg2[%43] : memref<16xi32, #tpu.memory_space<smem>>
      %c0_i32_19 = arith.constant 0 : i32
      %45 = arith.maxsi %44, %c0_i32_19 : i32
      %c63_i32 = arith.constant 63 : i32
      %46 = arith.minsi %45, %c63_i32 : i32
      %c0_i32_20 = arith.constant 0 : i32
      %47 = tpu.memref_slice %arg3[%46, %c0_i32_20] : memref<64x128xf32, #tpu.memory_space<any>> -> memref<1x128xf32, #tpu.memory_space<any>>
      %c0_i32_21 = arith.constant 0 : i32
      %48 = tpu.memref_slice %arg5[%40, %c0_i32_18, %c0_i32_21] : memref<2x16x128xf32, #tpu.memory_space<vmem>> -> memref<1x1x128xf32, #tpu.memory_space<vmem>>
      %49 = tpu.memref_squeeze %48 : memref<1x1x128xf32, #tpu.memory_space<vmem>> -> memref<1x128xf32, #tpu.memory_space<vmem>>
      %50 = tpu.memref_slice %arg6[%40] : memref<2x!tpu.dma_semaphore, #tpu.memory_space<semaphore_mem>> -> memref<1x!tpu.dma_semaphore, #tpu.memory_space<semaphore_mem>>
      %51 = tpu.memref_squeeze %50 : memref<1x!tpu.dma_semaphore, #tpu.memory_space<semaphore_mem>> -> memref<!tpu.dma_semaphore, #tpu.memory_space<semaphore_mem>>
      tpu.enqueue_dma source(%47 : memref<1x128xf32, #tpu.memory_space<any>>) target(%49 : memref<1x128xf32, #tpu.memory_space<vmem>>) target_semaphore(%51 : memref<!tpu.dma_semaphore, #tpu.memory_space<semaphore_mem>>)
      %c1_i32_22 = arith.constant 1 : i32
      %c16_i32_23 = arith.constant 16 : i32
      %52 = arith.muli %39, %c16_i32_23 : i32
      %53 = arith.addi %52, %c1_i32_22 : i32
      %54 = arith.index_cast %53 : i32 to index
      %55 = memref.load %arg2[%54] : memref<16xi32, #tpu.memory_space<smem>>
      %c0_i32_24 = arith.constant 0 : i32
      %56 = arith.maxsi %55, %c0_i32_24 : i32
      %c63_i32_25 = arith.constant 63 : i32
      %57 = arith.minsi %56, %c63_i32_25 : i32
      %c0_i32_26 = arith.constant 0 : i32
      %58 = tpu.memref_slice %arg3[%57, %c0_i32_26] : memref<64x128xf32, #tpu.memory_space<any>> -> memref<1x128xf32, #tpu.memory_space<any>>
      %c0_i32_27 = arith.constant 0 : i32
      %59 = tpu.memref_slice %arg5[%40, %c1_i32_22, %c0_i32_27] : memref<2x16x128xf32, #tpu.memory_space<vmem>> -> memref<1x1x128xf32, #tpu.memory_space<vmem>>
      %60 = tpu.memref_squeeze %59 : memref<1x1x128xf32, #tpu.memory_space<vmem>> -> memref<1x128xf32, #tpu.memory_space<vmem>>
      %61 = tpu.memref_slice %arg6[%40] : memref<2x!tpu.dma_semaphore, #tpu.memory_space<semaphore_mem>> -> memref<1x!tpu.dma_semaphore, #tpu.memory_space<semaphore_mem>>
      %62 = tpu.memref_squeeze %61 : memref<1x!tpu.dma_semaphore, #tpu.memory_space<semaphore_mem>> -> memref<!tpu.dma_semaphore, #tpu.memory_space<semaphore_mem>>
      tpu.enqueue_dma source(%58 : memref<1x128xf32, #tpu.memory_space<any>>) target(%60 : memref<1x128xf32, #tpu.memory_space<vmem>>) target_semaphore(%62 : memref<!tpu.dma_semaphore, #tpu.memory_space<semaphore_mem>>)
      %c2_i32_28 = arith.constant 2 : i32
      %c16_i32_29 = arith.constant 16 : i32
      %63 = arith.muli %39, %c16_i32_29 : i32
      %64 = arith.addi %63, %c2_i32_28 : i32
      %65 = arith.index_cast %64 : i32 to index
      %66 = memref.load %arg2[%65] : memref<16xi32, #tpu.memory_space<smem>>
      %c0_i32_30 = arith.constant 0 : i32
      %67 = arith.maxsi %66, %c0_i32_30 : i32
      %c63_i32_31 = arith.constant 63 : i32
      %68 = arith.minsi %67, %c63_i32_31 : i32
      %c0_i32_32 = arith.constant 0 : i32
      %69 = tpu.memref_slice %arg3[%68, %c0_i32_32] : memref<64x128xf32, #tpu.memory_space<any>> -> memref<1x128xf32, #tpu.memory_space<any>>
      %c0_i32_33 = arith.constant 0 : i32
      %70 = tpu.memref_slice %arg5[%40, %c2_i32_28, %c0_i32_33] : memref<2x16x128xf32, #tpu.memory_space<vmem>> -> memref<1x1x128xf32, #tpu.memory_space<vmem>>
      %71 = tpu.memref_squeeze %70 : memref<1x1x128xf32, #tpu.memory_space<vmem>> -> memref<1x128xf32, #tpu.memory_space<vmem>>
      %72 = tpu.memref_slice %arg6[%40] : memref<2x!tpu.dma_semaphore, #tpu.memory_space<semaphore_mem>> -> memref<1x!tpu.dma_semaphore, #tpu.memory_space<semaphore_mem>>
      %73 = tpu.memref_squeeze %72 : memref<1x!tpu.dma_semaphore, #tpu.memory_space<semaphore_mem>> -> memref<!tpu.dma_semaphore, #tpu.memory_space<semaphore_mem>>
      tpu.enqueue_dma source(%69 : memref<1x128xf32, #tpu.memory_space<any>>) target(%71 : memref<1x128xf32, #tpu.memory_space<vmem>>) target_semaphore(%73 : memref<!tpu.dma_semaphore, #tpu.memory_space<semaphore_mem>>)
      %c3_i32 = arith.constant 3 : i32
      %c16_i32_34 = arith.constant 16 : i32
      %74 = arith.muli %39, %c16_i32_34 : i32
      %75 = arith.addi %74, %c3_i32 : i32
      %76 = arith.index_cast %75 : i32 to index
      %77 = memref.load %arg2[%76] : memref<16xi32, #tpu.memory_space<smem>>
      %c0_i32_35 = arith.constant 0 : i32
      %78 = arith.maxsi %77, %c0_i32_35 : i32
      %c63_i32_36 = arith.constant 63 : i32
      %79 = arith.minsi %78, %c63_i32_36 : i32
      %c0_i32_37 = arith.constant 0 : i32
      %80 = tpu.memref_slice %arg3[%79, %c0_i32_37] : memref<64x128xf32, #tpu.memory_space<any>> -> memref<1x128xf32, #tpu.memory_space<any>>
      %c0_i32_38 = arith.constant 0 : i32
      %81 = tpu.memref_slice %arg5[%40, %c3_i32, %c0_i32_38] : memref<2x16x128xf32, #tpu.memory_space<vmem>> -> memref<1x1x128xf32, #tpu.memory_space<vmem>>
      %82 = tpu.memref_squeeze %81 : memref<1x1x128xf32, #tpu.memory_space<vmem>> -> memref<1x128xf32, #tpu.memory_space<vmem>>
      %83 = tpu.memref_slice %arg6[%40] : memref<2x!tpu.dma_semaphore, #tpu.memory_space<semaphore_mem>> -> memref<1x!tpu.dma_semaphore, #tpu.memory_space<semaphore_mem>>
      %84 = tpu.memref_squeeze %83 : memref<1x!tpu.dma_semaphore, #tpu.memory_space<semaphore_mem>> -> memref<!tpu.dma_semaphore, #tpu.memory_space<semaphore_mem>>
      tpu.enqueue_dma source(%80 : memref<1x128xf32, #tpu.memory_space<any>>) target(%82 : memref<1x128xf32, #tpu.memory_space<vmem>>) target_semaphore(%84 : memref<!tpu.dma_semaphore, #tpu.memory_space<semaphore_mem>>)
      %c4_i32 = arith.constant 4 : i32
      %c16_i32_39 = arith.constant 16 : i32
      %85 = arith.muli %39, %c16_i32_39 : i32
      %86 = arith.addi %85, %c4_i32 : i32
      %87 = arith.index_cast %86 : i32 to index
      %88 = memref.load %arg2[%87] : memref<16xi32, #tpu.memory_space<smem>>
      %c0_i32_40 = arith.constant 0 : i32
      %89 = arith.maxsi %88, %c0_i32_40 : i32
      %c63_i32_41 = arith.constant 63 : i32
      %90 = arith.minsi %89, %c63_i32_41 : i32
      %c0_i32_42 = arith.constant 0 : i32
      %91 = tpu.memref_slice %arg3[%90, %c0_i32_42] : memref<64x128xf32, #tpu.memory_space<any>> -> memref<1x128xf32, #tpu.memory_space<any>>
      %c0_i32_43 = arith.constant 0 : i32
      %92 = tpu.memref_slice %arg5[%40, %c4_i32, %c0_i32_43] : memref<2x16x128xf32, #tpu.memory_space<vmem>> -> memref<1x1x128xf32, #tpu.memory_space<vmem>>
      %93 = tpu.memref_squeeze %92 : memref<1x1x128xf32, #tpu.memory_space<vmem>> -> memref<1x128xf32, #tpu.memory_space<vmem>>
      %94 = tpu.memref_slice %arg6[%40] : memref<2x!tpu.dma_semaphore, #tpu.memory_space<semaphore_mem>> -> memref<1x!tpu.dma_semaphore, #tpu.memory_space<semaphore_mem>>
      %95 = tpu.memref_squeeze %94 : memref<1x!tpu.dma_semaphore, #tpu.memory_space<semaphore_mem>> -> memref<!tpu.dma_semaphore, #tpu.memory_space<semaphore_mem>>
      tpu.enqueue_dma source(%91 : memref<1x128xf32, #tpu.memory_space<any>>) target(%93 : memref<1x128xf32, #tpu.memory_space<vmem>>) target_semaphore(%95 : memref<!tpu.dma_semaphore, #tpu.memory_space<semaphore_mem>>)
      %c5_i32 = arith.constant 5 : i32
      %c16_i32_44 = arith.constant 16 : i32
      %96 = arith.muli %39, %c16_i32_44 : i32
      %97 = arith.addi %96, %c5_i32 : i32
      %98 = arith.index_cast %97 : i32 to index
      %99 = memref.load %arg2[%98] : memref<16xi32, #tpu.memory_space<smem>>
      %c0_i32_45 = arith.constant 0 : i32
      %100 = arith.maxsi %99, %c0_i32_45 : i32
      %c63_i32_46 = arith.constant 63 : i32
      %101 = arith.minsi %100, %c63_i32_46 : i32
      %c0_i32_47 = arith.constant 0 : i32
      %102 = tpu.memref_slice %arg3[%101, %c0_i32_47] : memref<64x128xf32, #tpu.memory_space<any>> -> memref<1x128xf32, #tpu.memory_space<any>>
      %c0_i32_48 = arith.constant 0 : i32
      %103 = tpu.memref_slice %arg5[%40, %c5_i32, %c0_i32_48] : memref<2x16x128xf32, #tpu.memory_space<vmem>> -> memref<1x1x128xf32, #tpu.memory_space<vmem>>
      %104 = tpu.memref_squeeze %103 : memref<1x1x128xf32, #tpu.memory_space<vmem>> -> memref<1x128xf32, #tpu.memory_space<vmem>>
      %105 = tpu.memref_slice %arg6[%40] : memref<2x!tpu.dma_semaphore, #tpu.memory_space<semaphore_mem>> -> memref<1x!tpu.dma_semaphore, #tpu.memory_space<semaphore_mem>>
      %106 = tpu.memref_squeeze %105 : memref<1x!tpu.dma_semaphore, #tpu.memory_space<semaphore_mem>> -> memref<!tpu.dma_semaphore, #tpu.memory_space<semaphore_mem>>
      tpu.enqueue_dma source(%102 : memref<1x128xf32, #tpu.memory_space<any>>) target(%104 : memref<1x128xf32, #tpu.memory_space<vmem>>) target_semaphore(%106 : memref<!tpu.dma_semaphore, #tpu.memory_space<semaphore_mem>>)
      %c6_i32 = arith.constant 6 : i32
      %c16_i32_49 = arith.constant 16 : i32
      %107 = arith.muli %39, %c16_i32_49 : i32
      %108 = arith.addi %107, %c6_i32 : i32
      %109 = arith.index_cast %108 : i32 to index
      %110 = memref.load %arg2[%109] : memref<16xi32, #tpu.memory_space<smem>>
      %c0_i32_50 = arith.constant 0 : i32
      %111 = arith.maxsi %110, %c0_i32_50 : i32
      %c63_i32_51 = arith.constant 63 : i32
      %112 = arith.minsi %111, %c63_i32_51 : i32
      %c0_i32_52 = arith.constant 0 : i32
      %113 = tpu.memref_slice %arg3[%112, %c0_i32_52] : memref<64x128xf32, #tpu.memory_space<any>> -> memref<1x128xf32, #tpu.memory_space<any>>
      %c0_i32_53 = arith.constant 0 : i32
      %114 = tpu.memref_slice %arg5[%40, %c6_i32, %c0_i32_53] : memref<2x16x128xf32, #tpu.memory_space<vmem>> -> memref<1x1x128xf32, #tpu.memory_space<vmem>>
      %115 = tpu.memref_squeeze %114 : memref<1x1x128xf32, #tpu.memory_space<vmem>> -> memref<1x128xf32, #tpu.memory_space<vmem>>
      %116 = tpu.memref_slice %arg6[%40] : memref<2x!tpu.dma_semaphore, #tpu.memory_space<semaphore_mem>> -> memref<1x!tpu.dma_semaphore, #tpu.memory_space<semaphore_mem>>
      %117 = tpu.memref_squeeze %116 : memref<1x!tpu.dma_semaphore, #tpu.memory_space<semaphore_mem>> -> memref<!tpu.dma_semaphore, #tpu.memory_space<semaphore_mem>>
      tpu.enqueue_dma source(%113 : memref<1x128xf32, #tpu.memory_space<any>>) target(%115 : memref<1x128xf32, #tpu.memory_space<vmem>>) target_semaphore(%117 : memref<!tpu.dma_semaphore, #tpu.memory_space<semaphore_mem>>)
      %c7_i32 = arith.constant 7 : i32
      %c16_i32_54 = arith.constant 16 : i32
      %118 = arith.muli %39, %c16_i32_54 : i32
      %119 = arith.addi %118, %c7_i32 : i32
      %120 = arith.index_cast %119 : i32 to index
      %121 = memref.load %arg2[%120] : memref<16xi32, #tpu.memory_space<smem>>
      %c0_i32_55 = arith.constant 0 : i32
      %122 = arith.maxsi %121, %c0_i32_55 : i32
      %c63_i32_56 = arith.constant 63 : i32
      %123 = arith.minsi %122, %c63_i32_56 : i32
      %c0_i32_57 = arith.constant 0 : i32
      %124 = tpu.memref_slice %arg3[%123, %c0_i32_57] : memref<64x128xf32, #tpu.memory_space<any>> -> memref<1x128xf32, #tpu.memory_space<any>>
      %c0_i32_58 = arith.constant 0 : i32
      %125 = tpu.memref_slice %arg5[%40, %c7_i32, %c0_i32_58] : memref<2x16x128xf32, #tpu.memory_space<vmem>> -> memref<1x1x128xf32, #tpu.memory_space<vmem>>
      %126 = tpu.memref_squeeze %125 : memref<1x1x128xf32, #tpu.memory_space<vmem>> -> memref<1x128xf32, #tpu.memory_space<vmem>>
      %127 = tpu.memref_slice %arg6[%40] : memref<2x!tpu.dma_semaphore, #tpu.memory_space<semaphore_mem>> -> memref<1x!tpu.dma_semaphore, #tpu.memory_space<semaphore_mem>>
      %128 = tpu.memref_squeeze %127 : memref<1x!tpu.dma_semaphore, #tpu.memory_space<semaphore_mem>> -> memref<!tpu.dma_semaphore, #tpu.memory_space<semaphore_mem>>
      tpu.enqueue_dma source(%124 : memref<1x128xf32, #tpu.memory_space<any>>) target(%126 : memref<1x128xf32, #tpu.memory_space<vmem>>) target_semaphore(%128 : memref<!tpu.dma_semaphore, #tpu.memory_space<semaphore_mem>>)
      %c8_i32 = arith.constant 8 : i32
      %c16_i32_59 = arith.constant 16 : i32
      %129 = arith.muli %39, %c16_i32_59 : i32
      %130 = arith.addi %129, %c8_i32 : i32
      %131 = arith.index_cast %130 : i32 to index
      %132 = memref.load %arg2[%131] : memref<16xi32, #tpu.memory_space<smem>>
      %c0_i32_60 = arith.constant 0 : i32
      %133 = arith.maxsi %132, %c0_i32_60 : i32
      %c63_i32_61 = arith.constant 63 : i32
      %134 = arith.minsi %133, %c63_i32_61 : i32
      %c0_i32_62 = arith.constant 0 : i32
      %135 = tpu.memref_slice %arg3[%134, %c0_i32_62] : memref<64x128xf32, #tpu.memory_space<any>> -> memref<1x128xf32, #tpu.memory_space<any>>
      %c0_i32_63 = arith.constant 0 : i32
      %136 = tpu.memref_slice %arg5[%40, %c8_i32, %c0_i32_63] : memref<2x16x128xf32, #tpu.memory_space<vmem>> -> memref<1x1x128xf32, #tpu.memory_space<vmem>>
      %137 = tpu.memref_squeeze %136 : memref<1x1x128xf32, #tpu.memory_space<vmem>> -> memref<1x128xf32, #tpu.memory_space<vmem>>
      %138 = tpu.memref_slice %arg6[%40] : memref<2x!tpu.dma_semaphore, #tpu.memory_space<semaphore_mem>> -> memref<1x!tpu.dma_semaphore, #tpu.memory_space<semaphore_mem>>
      %139 = tpu.memref_squeeze %138 : memref<1x!tpu.dma_semaphore, #tpu.memory_space<semaphore_mem>> -> memref<!tpu.dma_semaphore, #tpu.memory_space<semaphore_mem>>
      tpu.enqueue_dma source(%135 : memref<1x128xf32, #tpu.memory_space<any>>) target(%137 : memref<1x128xf32, #tpu.memory_space<vmem>>) target_semaphore(%139 : memref<!tpu.dma_semaphore, #tpu.memory_space<semaphore_mem>>)
      %c9_i32 = arith.constant 9 : i32
      %c16_i32_64 = arith.constant 16 : i32
      %140 = arith.muli %39, %c16_i32_64 : i32
      %141 = arith.addi %140, %c9_i32 : i32
      %142 = arith.index_cast %141 : i32 to index
      %143 = memref.load %arg2[%142] : memref<16xi32, #tpu.memory_space<smem>>
      %c0_i32_65 = arith.constant 0 : i32
      %144 = arith.maxsi %143, %c0_i32_65 : i32
      %c63_i32_66 = arith.constant 63 : i32
      %145 = arith.minsi %144, %c63_i32_66 : i32
      %c0_i32_67 = arith.constant 0 : i32
      %146 = tpu.memref_slice %arg3[%145, %c0_i32_67] : memref<64x128xf32, #tpu.memory_space<any>> -> memref<1x128xf32, #tpu.memory_space<any>>
      %c0_i32_68 = arith.constant 0 : i32
      %147 = tpu.memref_slice %arg5[%40, %c9_i32, %c0_i32_68] : memref<2x16x128xf32, #tpu.memory_space<vmem>> -> memref<1x1x128xf32, #tpu.memory_space<vmem>>
      %148 = tpu.memref_squeeze %147 : memref<1x1x128xf32, #tpu.memory_space<vmem>> -> memref<1x128xf32, #tpu.memory_space<vmem>>
      %149 = tpu.memref_slice %arg6[%40] : memref<2x!tpu.dma_semaphore, #tpu.memory_space<semaphore_mem>> -> memref<1x!tpu.dma_semaphore, #tpu.memory_space<semaphore_mem>>
      %150 = tpu.memref_squeeze %149 : memref<1x!tpu.dma_semaphore, #tpu.memory_space<semaphore_mem>> -> memref<!tpu.dma_semaphore, #tpu.memory_space<semaphore_mem>>
      tpu.enqueue_dma source(%146 : memref<1x128xf32, #tpu.memory_space<any>>) target(%148 : memref<1x128xf32, #tpu.memory_space<vmem>>) target_semaphore(%150 : memref<!tpu.dma_semaphore, #tpu.memory_space<semaphore_mem>>)
      %c10_i32 = arith.constant 10 : i32
      %c16_i32_69 = arith.constant 16 : i32
      %151 = arith.muli %39, %c16_i32_69 : i32
      %152 = arith.addi %151, %c10_i32 : i32
      %153 = arith.index_cast %152 : i32 to index
      %154 = memref.load %arg2[%153] : memref<16xi32, #tpu.memory_space<smem>>
      %c0_i32_70 = arith.constant 0 : i32
      %155 = arith.maxsi %154, %c0_i32_70 : i32
      %c63_i32_71 = arith.constant 63 : i32
      %156 = arith.minsi %155, %c63_i32_71 : i32
      %c0_i32_72 = arith.constant 0 : i32
      %157 = tpu.memref_slice %arg3[%156, %c0_i32_72] : memref<64x128xf32, #tpu.memory_space<any>> -> memref<1x128xf32, #tpu.memory_space<any>>
      %c0_i32_73 = arith.constant 0 : i32
      %158 = tpu.memref_slice %arg5[%40, %c10_i32, %c0_i32_73] : memref<2x16x128xf32, #tpu.memory_space<vmem>> -> memref<1x1x128xf32, #tpu.memory_space<vmem>>
      %159 = tpu.memref_squeeze %158 : memref<1x1x128xf32, #tpu.memory_space<vmem>> -> memref<1x128xf32, #tpu.memory_space<vmem>>
      %160 = tpu.memref_slice %arg6[%40] : memref<2x!tpu.dma_semaphore, #tpu.memory_space<semaphore_mem>> -> memref<1x!tpu.dma_semaphore, #tpu.memory_space<semaphore_mem>>
      %161 = tpu.memref_squeeze %160 : memref<1x!tpu.dma_semaphore, #tpu.memory_space<semaphore_mem>> -> memref<!tpu.dma_semaphore, #tpu.memory_space<semaphore_mem>>
      tpu.enqueue_dma source(%157 : memref<1x128xf32, #tpu.memory_space<any>>) target(%159 : memref<1x128xf32, #tpu.memory_space<vmem>>) target_semaphore(%161 : memref<!tpu.dma_semaphore, #tpu.memory_space<semaphore_mem>>)
      %c11_i32 = arith.constant 11 : i32
      %c16_i32_74 = arith.constant 16 : i32
      %162 = arith.muli %39, %c16_i32_74 : i32
      %163 = arith.addi %162, %c11_i32 : i32
      %164 = arith.index_cast %163 : i32 to index
      %165 = memref.load %arg2[%164] : memref<16xi32, #tpu.memory_space<smem>>
      %c0_i32_75 = arith.constant 0 : i32
      %166 = arith.maxsi %165, %c0_i32_75 : i32
      %c63_i32_76 = arith.constant 63 : i32
      %167 = arith.minsi %166, %c63_i32_76 : i32
      %c0_i32_77 = arith.constant 0 : i32
      %168 = tpu.memref_slice %arg3[%167, %c0_i32_77] : memref<64x128xf32, #tpu.memory_space<any>> -> memref<1x128xf32, #tpu.memory_space<any>>
      %c0_i32_78 = arith.constant 0 : i32
      %169 = tpu.memref_slice %arg5[%40, %c11_i32, %c0_i32_78] : memref<2x16x128xf32, #tpu.memory_space<vmem>> -> memref<1x1x128xf32, #tpu.memory_space<vmem>>
      %170 = tpu.memref_squeeze %169 : memref<1x1x128xf32, #tpu.memory_space<vmem>> -> memref<1x128xf32, #tpu.memory_space<vmem>>
      %171 = tpu.memref_slice %arg6[%40] : memref<2x!tpu.dma_semaphore, #tpu.memory_space<semaphore_mem>> -> memref<1x!tpu.dma_semaphore, #tpu.memory_space<semaphore_mem>>
      %172 = tpu.memref_squeeze %171 : memref<1x!tpu.dma_semaphore, #tpu.memory_space<semaphore_mem>> -> memref<!tpu.dma_semaphore, #tpu.memory_space<semaphore_mem>>
      tpu.enqueue_dma source(%168 : memref<1x128xf32, #tpu.memory_space<any>>) target(%170 : memref<1x128xf32, #tpu.memory_space<vmem>>) target_semaphore(%172 : memref<!tpu.dma_semaphore, #tpu.memory_space<semaphore_mem>>)
      %c12_i32 = arith.constant 12 : i32
      %c16_i32_79 = arith.constant 16 : i32
      %173 = arith.muli %39, %c16_i32_79 : i32
      %174 = arith.addi %173, %c12_i32 : i32
      %175 = arith.index_cast %174 : i32 to index
      %176 = memref.load %arg2[%175] : memref<16xi32, #tpu.memory_space<smem>>
      %c0_i32_80 = arith.constant 0 : i32
      %177 = arith.maxsi %176, %c0_i32_80 : i32
      %c63_i32_81 = arith.constant 63 : i32
      %178 = arith.minsi %177, %c63_i32_81 : i32
      %c0_i32_82 = arith.constant 0 : i32
      %179 = tpu.memref_slice %arg3[%178, %c0_i32_82] : memref<64x128xf32, #tpu.memory_space<any>> -> memref<1x128xf32, #tpu.memory_space<any>>
      %c0_i32_83 = arith.constant 0 : i32
      %180 = tpu.memref_slice %arg5[%40, %c12_i32, %c0_i32_83] : memref<2x16x128xf32, #tpu.memory_space<vmem>> -> memref<1x1x128xf32, #tpu.memory_space<vmem>>
      %181 = tpu.memref_squeeze %180 : memref<1x1x128xf32, #tpu.memory_space<vmem>> -> memref<1x128xf32, #tpu.memory_space<vmem>>
      %182 = tpu.memref_slice %arg6[%40] : memref<2x!tpu.dma_semaphore, #tpu.memory_space<semaphore_mem>> -> memref<1x!tpu.dma_semaphore, #tpu.memory_space<semaphore_mem>>
      %183 = tpu.memref_squeeze %182 : memref<1x!tpu.dma_semaphore, #tpu.memory_space<semaphore_mem>> -> memref<!tpu.dma_semaphore, #tpu.memory_space<semaphore_mem>>
      tpu.enqueue_dma source(%179 : memref<1x128xf32, #tpu.memory_space<any>>) target(%181 : memref<1x128xf32, #tpu.memory_space<vmem>>) target_semaphore(%183 : memref<!tpu.dma_semaphore, #tpu.memory_space<semaphore_mem>>)
      %c13_i32 = arith.constant 13 : i32
      %c16_i32_84 = arith.constant 16 : i32
      %184 = arith.muli %39, %c16_i32_84 : i32
      %185 = arith.addi %184, %c13_i32 : i32
      %186 = arith.index_cast %185 : i32 to index
      %187 = memref.load %arg2[%186] : memref<16xi32, #tpu.memory_space<smem>>
      %c0_i32_85 = arith.constant 0 : i32
      %188 = arith.maxsi %187, %c0_i32_85 : i32
      %c63_i32_86 = arith.constant 63 : i32
      %189 = arith.minsi %188, %c63_i32_86 : i32
      %c0_i32_87 = arith.constant 0 : i32
      %190 = tpu.memref_slice %arg3[%189, %c0_i32_87] : memref<64x128xf32, #tpu.memory_space<any>> -> memref<1x128xf32, #tpu.memory_space<any>>
      %c0_i32_88 = arith.constant 0 : i32
      %191 = tpu.memref_slice %arg5[%40, %c13_i32, %c0_i32_88] : memref<2x16x128xf32, #tpu.memory_space<vmem>> -> memref<1x1x128xf32, #tpu.memory_space<vmem>>
      %192 = tpu.memref_squeeze %191 : memref<1x1x128xf32, #tpu.memory_space<vmem>> -> memref<1x128xf32, #tpu.memory_space<vmem>>
      %193 = tpu.memref_slice %arg6[%40] : memref<2x!tpu.dma_semaphore, #tpu.memory_space<semaphore_mem>> -> memref<1x!tpu.dma_semaphore, #tpu.memory_space<semaphore_mem>>
      %194 = tpu.memref_squeeze %193 : memref<1x!tpu.dma_semaphore, #tpu.memory_space<semaphore_mem>> -> memref<!tpu.dma_semaphore, #tpu.memory_space<semaphore_mem>>
      tpu.enqueue_dma source(%190 : memref<1x128xf32, #tpu.memory_space<any>>) target(%192 : memref<1x128xf32, #tpu.memory_space<vmem>>) target_semaphore(%194 : memref<!tpu.dma_semaphore, #tpu.memory_space<semaphore_mem>>)
      %c14_i32 = arith.constant 14 : i32
      %c16_i32_89 = arith.constant 16 : i32
      %195 = arith.muli %39, %c16_i32_89 : i32
      %196 = arith.addi %195, %c14_i32 : i32
      %197 = arith.index_cast %196 : i32 to index
      %198 = memref.load %arg2[%197] : memref<16xi32, #tpu.memory_space<smem>>
      %c0_i32_90 = arith.constant 0 : i32
      %199 = arith.maxsi %198, %c0_i32_90 : i32
      %c63_i32_91 = arith.constant 63 : i32
      %200 = arith.minsi %199, %c63_i32_91 : i32
      %c0_i32_92 = arith.constant 0 : i32
      %201 = tpu.memref_slice %arg3[%200, %c0_i32_92] : memref<64x128xf32, #tpu.memory_space<any>> -> memref<1x128xf32, #tpu.memory_space<any>>
      %c0_i32_93 = arith.constant 0 : i32
      %202 = tpu.memref_slice %arg5[%40, %c14_i32, %c0_i32_93] : memref<2x16x128xf32, #tpu.memory_space<vmem>> -> memref<1x1x128xf32, #tpu.memory_space<vmem>>
      %203 = tpu.memref_squeeze %202 : memref<1x1x128xf32, #tpu.memory_space<vmem>> -> memref<1x128xf32, #tpu.memory_space<vmem>>
      %204 = tpu.memref_slice %arg6[%40] : memref<2x!tpu.dma_semaphore, #tpu.memory_space<semaphore_mem>> -> memref<1x!tpu.dma_semaphore, #tpu.memory_space<semaphore_mem>>
      %205 = tpu.memref_squeeze %204 : memref<1x!tpu.dma_semaphore, #tpu.memory_space<semaphore_mem>> -> memref<!tpu.dma_semaphore, #tpu.memory_space<semaphore_mem>>
      tpu.enqueue_dma source(%201 : memref<1x128xf32, #tpu.memory_space<any>>) target(%203 : memref<1x128xf32, #tpu.memory_space<vmem>>) target_semaphore(%205 : memref<!tpu.dma_semaphore, #tpu.memory_space<semaphore_mem>>)
      %c15_i32 = arith.constant 15 : i32
      %c16_i32_94 = arith.constant 16 : i32
      %206 = arith.muli %39, %c16_i32_94 : i32
      %207 = arith.addi %206, %c15_i32 : i32
      %208 = arith.index_cast %207 : i32 to index
      %209 = memref.load %arg2[%208] : memref<16xi32, #tpu.memory_space<smem>>
      %c0_i32_95 = arith.constant 0 : i32
      %210 = arith.maxsi %209, %c0_i32_95 : i32
      %c63_i32_96 = arith.constant 63 : i32
      %211 = arith.minsi %210, %c63_i32_96 : i32
      %c0_i32_97 = arith.constant 0 : i32
      %212 = tpu.memref_slice %arg3[%211, %c0_i32_97] : memref<64x128xf32, #tpu.memory_space<any>> -> memref<1x128xf32, #tpu.memory_space<any>>
      %c0_i32_98 = arith.constant 0 : i32
      %213 = tpu.memref_slice %arg5[%40, %c15_i32, %c0_i32_98] : memref<2x16x128xf32, #tpu.memory_space<vmem>> -> memref<1x1x128xf32, #tpu.memory_space<vmem>>
      %214 = tpu.memref_squeeze %213 : memref<1x1x128xf32, #tpu.memory_space<vmem>> -> memref<1x128xf32, #tpu.memory_space<vmem>>
      %215 = tpu.memref_slice %arg6[%40] : memref<2x!tpu.dma_semaphore, #tpu.memory_space<semaphore_mem>> -> memref<1x!tpu.dma_semaphore, #tpu.memory_space<semaphore_mem>>
      %216 = tpu.memref_squeeze %215 : memref<1x!tpu.dma_semaphore, #tpu.memory_space<semaphore_mem>> -> memref<!tpu.dma_semaphore, #tpu.memory_space<semaphore_mem>>
      tpu.enqueue_dma source(%212 : memref<1x128xf32, #tpu.memory_space<any>>) target(%214 : memref<1x128xf32, #tpu.memory_space<vmem>>) target_semaphore(%216 : memref<!tpu.dma_semaphore, #tpu.memory_space<semaphore_mem>>)
      %c16_i32_99 = arith.constant 16 : i32
    } else {
    }
    %c0_i32_4 = arith.constant 0 : i32
    %c0_i32_5 = arith.constant 0 : i32
    %10 = tpu.memref_slice %arg3[%c0_i32_4, %c0_i32_5] : memref<64x128xf32, #tpu.memory_space<any>> -> memref<16x128xf32, #tpu.memory_space<any>>
    %c0_i32_6 = arith.constant 0 : i32
    %c0_i32_7 = arith.constant 0 : i32
    %11 = tpu.memref_slice %arg5[%2, %c0_i32_6, %c0_i32_7] : memref<2x16x128xf32, #tpu.memory_space<vmem>> -> memref<1x16x128xf32, #tpu.memory_space<vmem>>
    %12 = tpu.memref_squeeze %11 : memref<1x16x128xf32, #tpu.memory_space<vmem>> -> memref<16x128xf32, #tpu.memory_space<vmem>>
    %13 = tpu.memref_slice %arg6[%2] : memref<2x!tpu.dma_semaphore, #tpu.memory_space<semaphore_mem>> -> memref<1x!tpu.dma_semaphore, #tpu.memory_space<semaphore_mem>>
    %14 = tpu.memref_squeeze %13 : memref<1x!tpu.dma_semaphore, #tpu.memory_space<semaphore_mem>> -> memref<!tpu.dma_semaphore, #tpu.memory_space<semaphore_mem>>
    tpu.wait_dma2 semaphore(%14 : memref<!tpu.dma_semaphore, #tpu.memory_space<semaphore_mem>>) src(%10 : memref<16x128xf32, #tpu.memory_space<any>>) dst(%12 : memref<16x128xf32, #tpu.memory_space<vmem>>)
    %15 = arith.index_cast %2 : i32 to index
    %c0 = arith.constant 0 : index
    %c0_8 = arith.constant 0 : index
    %16 = vector.load %arg5[%15, %c0, %c0_8] : memref<2x16x128xf32, #tpu.memory_space<vmem>>, vector<1x16x128xf32>
    %17 = vector.shape_cast %16 : vector<1x16x128xf32> to vector<16x128xf32>
    %cst = arith.constant dense<0.000000e+00> : vector<16xf32>
    %18 = vector.multi_reduction <add>, %17, %cst [1] : vector<16x128xf32> to vector<16xf32>
    %19 = vector.shape_cast %18 : vector<16xf32> to vector<16x1xf32>
    %cst_9 = arith.constant 1.280000e+02 : f32
    %20 = vector.broadcast %cst_9 : f32 to vector<16x1xf32>
    %21 = arith.divf %19, %20 : vector<16x1xf32>
    %22 = arith.mulf %17, %17 : vector<16x128xf32>
    %cst_10 = arith.constant dense<0.000000e+00> : vector<16xf32>
    %23 = vector.multi_reduction <add>, %22, %cst_10 [1] : vector<16x128xf32> to vector<16xf32>
    %24 = vector.shape_cast %23 : vector<16xf32> to vector<16x1xf32>
    %cst_11 = arith.constant 1.280000e+02 : f32
    %25 = vector.broadcast %cst_11 : f32 to vector<16x1xf32>
    %26 = arith.divf %24, %25 : vector<16x1xf32>
    %27 = arith.mulf %21, %21 : vector<16x1xf32>
    %28 = arith.subf %26, %27 : vector<16x1xf32>
    %cst_12 = arith.constant 0.000000e+00 : f32
    %29 = vector.broadcast %cst_12 : f32 to vector<16x1xf32>
    %30 = arith.maximumf %28, %29 : vector<16x1xf32>
    %31 = vector.broadcast %21 : vector<16x1xf32> to vector<16x128xf32>
    %32 = arith.subf %17, %31 : vector<16x128xf32>
    %cst_13 = arith.constant 9.99999996E-13 : f32
    %33 = vector.broadcast %cst_13 : f32 to vector<16x1xf32>
    %34 = arith.addf %30, %33 : vector<16x1xf32>
    %35 = math.rsqrt %34 : vector<16x1xf32>
    %36 = vector.broadcast %35 : vector<16x1xf32> to vector<16x128xf32>
    %37 = arith.mulf %32, %36 : vector<16x128xf32>
    %c0_14 = arith.constant 0 : index
    %c0_15 = arith.constant 0 : index
    %38 = vector.load %arg4[%c0_14, %c0_15] : memref<16x128xf32, #tpu.memory_space<vmem>>, vector<16x128xf32>
    tpu.vector_store %arg4[%c0_14, %c0_15], %37 {strides = array<i32>} : memref<16x128xf32, #tpu.memory_space<vmem>>, vector<16x128xf32>,
    return
  }
  func.func @transform_1(%arg0: i32, %arg1: i32, %arg2: memref<16xi32, #tpu.memory_space<smem>>) -> (i32, i32) {
    %c1_i32 = arith.constant 1 : i32
    %0 = arith.muli %arg0, %c1_i32 : i32
    %1 = arith.addi %0, %arg1 : i32
    %c0_i32 = arith.constant 0 : i32
    %c0_i32_0 = arith.constant 0 : i32
    return %1, %c0_i32 : i32, i32
  }
}

</mosaic_0001>

<bundles_post_ra>
// kernel: tpu_custom_call.1
= control target key start
LH: loop header
LB: loop body
LE: loop exit
PB: predicated region body
PF: predicated region fallthrough
CT: control target
= control target key end

     0   :  { %s1607_s12 = smov [#allocation5]   ;;  %s1907_s0 = inlined_call_operand.hbm [shape: s32[16], index: 0, kind: input, shape index: {}]   ;;  %s1908_s1 = inlined_call_operand.hbm [shape: f32[64,128], index: 1, kind: input, shape index: {}]   ;;  %s1909_s2 = inlined_call_operand.hbm [shape: f32[16,128], index: 2, kind: output, shape index: {}]  }
   0x1   :  { %s8_s11 = sshll.u32 %s1907_s0, 4  ;;  %s9_s11 = int_to_ptr.hbm [resolvable:$true] %s8_s11 }
   0x2   :  { %11 = dma.hbm_to_smem %s9_s11, 16, %s1607_s12, [#allocation4] }
   0x3   :  { %1601 = dma.done.wait [#allocation4], 16 }
   0x4   :  { %1602 = vsyncadd [#allocation4], 4294967280 }
   0x5   :  { %14 = sfence }
   0x6   :  { %15 = vsyncpa [#allocation7], 0  ;;  %s26_s13 = sld [smem:[#allocation5]]  ;;  %s1608_s14 = smov [#allocation2]  }
   0x7   :  { %s1646_s15 = sshll.u32 %s1608_s14, 4  ;;  %s902_s16 = sld [smem:[#allocation5 + $0x1]]  ;;  %s42_s15 = int_to_ptr.vmem [resolvable:$true] %s1646_s15 }
   0x8   :  { %s1609_s17 = smov [#allocation2 + $0x1]   ;;  %s1651_s19 = sld [smem:[#allocation5 + $0x2]] }
   0x9   :  { %s1649_s18 = sshll.u32 %s1609_s17, 4  ;;  %s1610_s0 = smov [#allocation2 + $0x2]   ;;  %s63_s18 = int_to_ptr.vmem [resolvable:$true] %s1649_s18 }
   0xa   :  { %s1654_s20 = sshll.u32 %s1610_s0, 4  ;;  %s1656_s21 = sld [smem:[#allocation5 + $0x3]]  ;;  %s84_s20 = int_to_ptr.vmem [resolvable:$true] %s1654_s20 }
   0xb   :  { %s1668_s6 = scalar_lea.hbm %s1908_s1, 64 }
   0xc   :  { %p27_p0 = scmp.gt.s32.totalorder %s26_s13, 0  ;;  %p897_p1 = scmp.lt.s32.totalorder %s26_s13, 63 }
   0xd   :  { %p47_p2 = scmp.gt.s32.totalorder %s902_s16, 0  ;;  %p903_p3 = scmp.lt.s32.totalorder %s902_s16, 63 }
   0xe   :  { %s1911_s13 = smov (!%p27_p0, %s26_s13), 0  ;;  %p68_p4 = scmp.gt.s32.totalorder %s1651_s19, 0 }
   0xf   :  { %s1913_s16 = smov (!%p47_p2, %s902_s16), 0  ;;  %s1915_s13 = smov (!%p897_p1, %s1911_s13), 63 }
  0x10   :  { %s1917_s16 = smov (!%p903_p3, %s1913_s16), 63  ;;  %s31_s24 = scalar_lea.hbm %s1908_s1, %s1915_s13 }
  0x11   :  { %s39_s25 = sshll.u32 %s31_s24, 4  ;;  %s51_s28 = scalar_lea.hbm %s1908_s1, %s1917_s16  ;;  %s40_s25 = int_to_ptr.hbm [resolvable:$true] %s39_s25 }
  0x12   :  { %s60_s29 = sshll.u32 %s51_s28, 4  ;;  %s1193_s30 = sshra.s32 %s40_s25, 4  ;;  %s1194_s30 = int_to_ptr.hbm [resolvable:$true] %s1193_s30  ;;  %s61_s29 = int_to_ptr.hbm [resolvable:$true] %s60_s29 }
  0x13   :  { %s1195_s3 = scalar_lea.hbm %s1194_s30, 1  ;;  %p1198_p6 = scmp.lt.s32.totalorder %s1194_s30, %s1908_s1 }
  0x14   :  { %p1196_p5 = scmp.ne.s32.totalorder %s1194_s30, %s1195_s3  ;;  %p1199_p7 = scmp.lt.s32.totalorder %s1668_s6, %s1195_s3 }
  0x16   :  { %p1200_p8 = por %p1199_p7, %p1198_p6 }
  0x18   :  { %p1201_p9 = pnand %p1200_p8, %p1196_p5 }
  0x1a   :  { %1204 = shalt.err (!%p1201_p9)  }
  0x1b   :  { %44 = dma.hbm_to_vmem [thread:$0]  %s40_s25, 16, %s42_s15, [#allocation3] }
  0x1c   :  { %p909_p10 = scmp.lt.s32.totalorder %s1651_s19, 63  ;;  %s1217_s9 = sshra.s32 %s61_s29, 4  ;;  %s1218_s9 = int_to_ptr.hbm [resolvable:$true] %s1217_s9 }
  0x1d   :  { %s1219_s10 = scalar_lea.hbm %s1218_s9, 1  ;;  %p1222_p12 = scmp.lt.s32.totalorder %s1218_s9, %s1908_s1 }
  0x1e   :  { %p1220_p11 = scmp.ne.s32.totalorder %s1218_s9, %s1219_s10  ;;  %p1223_p13 = scmp.lt.s32.totalorder %s1668_s6, %s1219_s10 }
  0x20   :  { %p1224_p0 = por %p1223_p13, %p1222_p12 }
  0x22   :  { %p1225_p1 = pnand %p1224_p0, %p1220_p11 }
  0x24   :  { %1228 = shalt.err (!%p1225_p1)  }
  0x25   :  { %65 = dma.hbm_to_vmem [thread:$0]  %s61_s29, 16, %s63_s18, [#allocation3] }
  0x26   :  { %s69_s13 = scalar_select %p68_p4, %s1651_s19, 0 }
  0x27   :  { %p89_p2 = scmp.gt.s32.totalorder %s1656_s21, 0  ;;  %p915_p3 = scmp.lt.s32.totalorder %s1656_s21, 63 }
  0x28   :  { %s1919_s13 = smov (!%p909_p10, %s69_s13), 63  ;;  %s1611_s22 = smov [#allocation2 + $0x3]  }
  0x29   :  { %s90_s14 = scalar_select %p89_p2, %s1656_s21, 0 }
  0x2a   :  { %s72_s17 = scalar_lea.hbm %s1908_s1, %s1919_s13  ;;  %s1695_s23 = sshll.u32 %s1611_s22, 4  ;;  %s105_s23 = int_to_ptr.vmem [resolvable:$true] %s1695_s23 }
  0x2b   :  { %s81_s0 = sshll.u32 %s72_s17, 4  ;;  %s82_s0 = int_to_ptr.hbm [resolvable:$true] %s81_s0 }
  0x2c   :  { %s1241_s24 = sshra.s32 %s82_s0, 4  ;;  %s1242_s24 = int_to_ptr.hbm [resolvable:$true] %s1241_s24 }
  0x2d   :  { %s1243_s18 = scalar_lea.hbm %s1242_s24, 1  ;;  %p1246_p5 = scmp.lt.s32.totalorder %s1242_s24, %s1908_s1 }
  0x2e   :  { %p1244_p4 = scmp.ne.s32.totalorder %s1242_s24, %s1243_s18  ;;  %p1247_p6 = scmp.lt.s32.totalorder %s1668_s6, %s1243_s18 }
  0x30   :  { %p1248_p7 = por %p1247_p6, %p1246_p5 }
  0x32   :  { %p1249_p8 = pnand %p1248_p7, %p1244_p4 }
  0x34   :  { %1252 = shalt.err (!%p1249_p8)  }
  0x35   :  { %86 = dma.hbm_to_vmem [thread:$0]  %s82_s0, 16, %s84_s20, [#allocation3] }
  0x36   :  { %s1921_s14 = smov (!%p915_p3, %s90_s14), 63  ;;  %s920_s19 = sld [smem:[#allocation5 + $0x4]] }
  0x37   :  { %s93_s29 = scalar_lea.hbm %s1908_s1, %s1921_s14  ;;  %s1612_s3 = smov [#allocation2 + $0x4]  }
  0x38   :  { %s102_s30 = sshll.u32 %s93_s29, 4  ;;  %s1707_s4 = sshll.u32 %s1612_s3, 4  ;;  %s103_s30 = int_to_ptr.hbm [resolvable:$true] %s102_s30  ;;  %s126_s4 = int_to_ptr.vmem [resolvable:$true] %s1707_s4 }
  0x39   :  { %s1265_s5 = sshra.s32 %s103_s30, 4  ;;  %s1266_s5 = int_to_ptr.hbm [resolvable:$true] %s1265_s5 }
  0x3a   :  { %s1267_s20 = scalar_lea.hbm %s1266_s5, 1  ;;  %p1270_p10 = scmp.lt.s32.totalorder %s1266_s5, %s1908_s1 }
  0x3b   :  { %p1268_p9 = scmp.ne.s32.totalorder %s1266_s5, %s1267_s20  ;;  %p1271_p11 = scmp.lt.s32.totalorder %s1668_s6, %s1267_s20 }
  0x3d   :  { %p1272_p12 = por %p1271_p11, %p1270_p10 }
  0x3f   :  { %p1273_p13 = pnand %p1272_p12, %p1268_p9 }
  0x41   :  { %1276 = shalt.err (!%p1273_p13)  }
  0x42   :  { %107 = dma.hbm_to_vmem [thread:$0]  %s103_s30, 16, %s105_s23, [#allocation3] }
  0x43   :  { %s1714_s8 = sld [smem:[#allocation5 + $0x5]]  ;;  %p110_p0 = scmp.gt.s32.totalorder %s920_s19, 0 }
  0x44   :  { %p921_p1 = scmp.lt.s32.totalorder %s920_s19, 63  ;;  %s1613_s9 = smov [#allocation2 + $0x5]  }
  0x45   :  { %s1716_s10 = sshll.u32 %s1613_s9, 4  ;;  %s932_s11 = sld [smem:[#allocation5 + $0x6]]  ;;  %s147_s10 = int_to_ptr.vmem [resolvable:$true] %s1716_s10 }
  0x46   :  { %s1923_s19 = smov (!%p110_p0, %s920_s19), 0  ;;  %s1614_s15 = smov [#allocation2 + $0x6]  }
  0x47   :  { %s1925_s19 = smov (!%p921_p1, %s1923_s19), 63  ;;  %s1724_s16 = sshll.u32 %s1614_s15, 4  ;;  %s168_s16 = int_to_ptr.vmem [resolvable:$true] %s1724_s16 }
  0x48   :  { %s114_s14 = scalar_lea.hbm %s1908_s1, %s1925_s19 }
  0x49   :  { %p131_p2 = scmp.gt.s32.totalorder %s1714_s8, 0  ;;  %p927_p3 = scmp.lt.s32.totalorder %s1714_s8, 63 }
  0x4a   :  { %s123_s17 = sshll.u32 %s114_s14, 4  ;;  %s124_s17 = int_to_ptr.hbm [resolvable:$true] %s123_s17 }
  0x4b   :  { %p152_p4 = scmp.gt.s32.totalorder %s932_s11, 0  ;;  %p933_p5 = scmp.lt.s32.totalorder %s932_s11, 63 }
  0x4c   :  { %s1289_s0 = sshra.s32 %s124_s17, 4  ;;  %s1290_s0 = int_to_ptr.hbm [resolvable:$true] %s1289_s0 }
  0x4d   :  { %s1291_s22 = scalar_lea.hbm %s1290_s0, 1  ;;  %p1294_p7 = scmp.lt.s32.totalorder %s1290_s0, %s1908_s1 }
  0x4e   :  { %p1292_p6 = scmp.ne.s32.totalorder %s1290_s0, %s1291_s22  ;;  %p1295_p8 = scmp.lt.s32.totalorder %s1668_s6, %s1291_s22 }
  0x50   :  { %p1296_p9 = por %p1295_p8, %p1294_p7 }
  0x52   :  { %p1297_p10 = pnand %p1296_p9, %p1292_p6 }
  0x54   :  { %1300 = shalt.err (!%p1297_p10)  }
  0x55   :  { %128 = dma.hbm_to_vmem [thread:$0]  %s124_s17, 16, %s126_s4, [#allocation3] }
  0x56   :  { %s132_s18 = scalar_select %p131_p2, %s1714_s8, 0 }
  0x57   :  { %s153_s25 = scalar_select %p152_p4, %s932_s11, 0 }
  0x58   :  { %s1927_s18 = smov (!%p927_p3, %s132_s18), 63 }
  0x59   :  { %s1929_s25 = smov (!%p933_p5, %s153_s25), 63  ;;  %s135_s27 = scalar_lea.hbm %s1908_s1, %s1927_s18 }
  0x5a   :  { %s144_s28 = sshll.u32 %s135_s27, 4  ;;  %s156_s3 = scalar_lea.hbm %s1908_s1, %s1929_s25  ;;  %s145_s28 = int_to_ptr.hbm [resolvable:$true] %s144_s28 }
  0x5b   :  { %s165_s4 = sshll.u32 %s156_s3, 4  ;;  %s1313_s5 = sshra.s32 %s145_s28, 4  ;;  %s1314_s5 = int_to_ptr.hbm [resolvable:$true] %s1313_s5  ;;  %s166_s4 = int_to_ptr.hbm [resolvable:$true] %s165_s4 }
  0x5c   :  { %s1315_s20 = scalar_lea.hbm %s1314_s5, 1  ;;  %p1318_p12 = scmp.lt.s32.totalorder %s1314_s5, %s1908_s1 }
  0x5d   :  { %p1316_p11 = scmp.ne.s32.totalorder %s1314_s5, %s1315_s20  ;;  %p1319_p13 = scmp.lt.s32.totalorder %s1668_s6, %s1315_s20 }
  0x5f   :  { %p1320_p0 = por %p1319_p13, %p1318_p12 }
  0x61   :  { %p1321_p1 = pnand %p1320_p0, %p1316_p11 }
  0x63   :  { %1324 = shalt.err (!%p1321_p1)  }
  0x64   :  { %149 = dma.hbm_to_vmem [thread:$0]  %s145_s28, 16, %s147_s10, [#allocation3] }
  0x65   :  { %s938_s8 = sld [smem:[#allocation5 + $0x7]]  ;;  %s1337_s9 = sshra.s32 %s166_s4, 4  ;;  %s1338_s9 = int_to_ptr.hbm [resolvable:$true] %s1337_s9 }
  0x66   :  { %s1339_s11 = scalar_lea.hbm %s1338_s9, 1  ;;  %p1342_p3 = scmp.lt.s32.totalorder %s1338_s9, %s1908_s1 }
  0x67   :  { %p1340_p2 = scmp.ne.s32.totalorder %s1338_s9, %s1339_s11  ;;  %p1343_p4 = scmp.lt.s32.totalorder %s1668_s6, %s1339_s11 }
  0x69   :  { %p1344_p5 = por %p1343_p4, %p1342_p3 }
  0x6b   :  { %p1345_p6 = pnand %p1344_p5, %p1340_p2 }
  0x6d   :  { %1348 = shalt.err (!%p1345_p6)  }
  0x6e   :  { %170 = dma.hbm_to_vmem [thread:$0]  %s166_s4, 16, %s168_s16, [#allocation3] }
  0x6f   :  { %s1756_s14 = sld [smem:[#allocation5 + $0x8]]  ;;  %s1615_s10 = smov [#allocation2 + $0x7]  }
  0x70   :  { %s1758_s15 = sshll.u32 %s1615_s10, 4  ;;  %s1616_s17 = smov [#allocation2 + $0x8]   ;;  %s189_s15 = int_to_ptr.vmem [resolvable:$true] %s1758_s15 }
  0x71   :  { %s1761_s0 = sshll.u32 %s1616_s17, 4  ;;  %s1764_s22 = sld [smem:[#allocation5 + $0x9]]  ;;  %s210_s0 = int_to_ptr.vmem [resolvable:$true] %s1761_s0 }
  0x72   :  { %p173_p7 = scmp.gt.s32.totalorder %s938_s8, 0  ;;  %p939_p8 = scmp.lt.s32.totalorder %s938_s8, 63 }
  0x73   :  { %s1766_s16 = sld [smem:[#allocation5 + $0xa]]  ;;  %s1617_s19 = smov [#allocation2 + $0x9]  }
  0x74   :  { %s1931_s8 = smov (!%p173_p7, %s938_s8), 0  ;;  %s1776_s27 = sshll.u32 %s1617_s19, 4  ;;  %s231_s27 = int_to_ptr.vmem [resolvable:$true] %s1776_s27 }
  0x75   :  { %p194_p9 = scmp.gt.s32.totalorder %s1756_s14, 0  ;;  %p945_p10 = scmp.lt.s32.totalorder %s1756_s14, 63 }
  0x76   :  { %s1933_s8 = smov (!%p939_p8, %s1931_s8), 63 }
  0x77   :  { %s195_s23 = scalar_select %p194_p9, %s1756_s14, 0 }
  0x78   :  { %s177_s25 = scalar_lea.hbm %s1908_s1, %s1933_s8  ;;  %p215_p11 = scmp.gt.s32.totalorder %s1764_s22, 0 }
  0x79   :  { %s186_s26 = sshll.u32 %s177_s25, 4  ;;  %p951_p12 = scmp.lt.s32.totalorder %s1764_s22, 63  ;;  %s187_s26 = int_to_ptr.hbm [resolvable:$true] %s186_s26 }
  0x7a   :  { %s1361_s28 = sshra.s32 %s187_s26, 4  ;;  %s1362_s28 = int_to_ptr.hbm [resolvable:$true] %s1361_s28 }
  0x7b   :  { %s1363_s29 = scalar_lea.hbm %s1362_s28, 1  ;;  %p1366_p0 = scmp.lt.s32.totalorder %s1362_s28, %s1908_s1 }
  0x7c   :  { %p1364_p13 = scmp.ne.s32.totalorder %s1362_s28, %s1363_s29  ;;  %p1367_p1 = scmp.lt.s32.totalorder %s1668_s6, %s1363_s29 }
  0x7e   :  { %p1368_p2 = por %p1367_p1, %p1366_p0 }
  0x80   :  { %p1369_p3 = pnand %p1368_p2, %p1364_p13 }
  0x82   :  { %1372 = shalt.err (!%p1369_p3)  }
  0x83   :  { %191 = dma.hbm_to_vmem [thread:$0]  %s187_s26, 16, %s189_s15, [#allocation3] }
  0x84   :  { %s1935_s23 = smov (!%p945_p10, %s195_s23), 63  ;;  %p236_p4 = scmp.gt.s32.totalorder %s1766_s16, 0 }
  0x85   :  { %s216_s4 = scalar_select %p215_p11, %s1764_s22, 0 }
  0x86   :  { %s198_s21 = scalar_lea.hbm %s1908_s1, %s1935_s23  ;;  %p957_p5 = scmp.lt.s32.totalorder %s1766_s16, 63 }
  0x87   :  { %s207_s7 = sshll.u32 %s198_s21, 4  ;;  %s208_s7 = int_to_ptr.hbm [resolvable:$true] %s207_s7 }
  0x88   :  { %s1385_s8 = sshra.s32 %s208_s7, 4  ;;  %s1386_s8 = int_to_ptr.hbm [resolvable:$true] %s1385_s8 }
  0x89   :  { %s1387_s9 = scalar_lea.hbm %s1386_s8, 1  ;;  %p1390_p7 = scmp.lt.s32.totalorder %s1386_s8, %s1908_s1 }
  0x8a   :  { %p1388_p6 = scmp.ne.s32.totalorder %s1386_s8, %s1387_s9  ;;  %p1391_p8 = scmp.lt.s32.totalorder %s1668_s6, %s1387_s9 }
  0x8c   :  { %p1392_p9 = por %p1391_p8, %p1390_p7 }
  0x8e   :  { %p1393_p10 = pnand %p1392_p9, %p1388_p6 }
  0x90   :  { %1396 = shalt.err (!%p1393_p10)  }
  0x91   :  { %212 = dma.hbm_to_vmem [thread:$0]  %s208_s7, 16, %s210_s0, [#allocation3] }
  0x92   :  { %s1937_s4 = smov (!%p951_p12, %s216_s4), 63  ;;  %s1618_s23 = smov [#allocation2 + $0xa]  }
  0x93   :  { %s237_s13 = scalar_select %p236_p4, %s1766_s16, 0 }
  0x94   :  { %s219_s15 = scalar_lea.hbm %s1908_s1, %s1937_s4  ;;  %s1809_s24 = sshll.u32 %s1618_s23, 4  ;;  %s252_s24 = int_to_ptr.vmem [resolvable:$true] %s1809_s24 }
  0x95   :  { %s228_s17 = sshll.u32 %s219_s15, 4  ;;  %s229_s17 = int_to_ptr.hbm [resolvable:$true] %s228_s17 }
  0x96   :  { %s1409_s18 = sshra.s32 %s229_s17, 4  ;;  %s1410_s18 = int_to_ptr.hbm [resolvable:$true] %s1409_s18 }
  0x97   :  { %s1411_s25 = scalar_lea.hbm %s1410_s18, 1  ;;  %p1414_p13 = scmp.lt.s32.totalorder %s1410_s18, %s1908_s1 }
  0x98   :  { %p1412_p11 = scmp.ne.s32.totalorder %s1410_s18, %s1411_s25  ;;  %p1415_p12 = scmp.lt.s32.totalorder %s1668_s6, %s1411_s25 }
  0x9a   :  { %p1416_p0 = por %p1415_p12, %p1414_p13 }
  0x9c   :  { %p1417_p1 = pnand %p1416_p0, %p1412_p11 }
  0x9e   :  { %1420 = shalt.err (!%p1417_p1)  }
  0x9f   :  { %233 = dma.hbm_to_vmem [thread:$0]  %s229_s17, 16, %s231_s27, [#allocation3] }
  0xa0   :  { %s1939_s13 = smov (!%p957_p5, %s237_s13), 63  ;;  %s962_s0 = sld [smem:[#allocation5 + $0xb]] }
  0xa1   :  { %s240_s29 = scalar_lea.hbm %s1908_s1, %s1939_s13  ;;  %s1619_s3 = smov [#allocation2 + $0xb]  }
  0xa2   :  { %s249_s30 = sshll.u32 %s240_s29, 4  ;;  %s1823_s4 = sshll.u32 %s1619_s3, 4  ;;  %s250_s30 = int_to_ptr.hbm [resolvable:$true] %s249_s30  ;;  %s273_s4 = int_to_ptr.vmem [resolvable:$true] %s1823_s4 }
  0xa3   :  { %s1825_s5 = sld [smem:[#allocation5 + $0xc]]  ;;  %s1433_s20 = sshra.s32 %s250_s30, 4  ;;  %s1434_s20 = int_to_ptr.hbm [resolvable:$true] %s1433_s20 }
  0xa4   :  { %s1435_s21 = scalar_lea.hbm %s1434_s20, 1  ;;  %p1438_p3 = scmp.lt.s32.totalorder %s1434_s20, %s1908_s1 }
  0xa5   :  { %p1436_p2 = scmp.ne.s32.totalorder %s1434_s20, %s1435_s21  ;;  %p1439_p4 = scmp.lt.s32.totalorder %s1668_s6, %s1435_s21 }
  0xa7   :  { %p1440_p5 = por %p1439_p4, %p1438_p3 }
  0xa9   :  { %p1441_p6 = pnand %p1440_p5, %p1436_p2 }
  0xab   :  { %1444 = shalt.err (!%p1441_p6)  }
  0xac   :  { %254 = dma.hbm_to_vmem [thread:$0]  %s250_s30, 16, %s252_s24, [#allocation3] }
  0xad   :  { %s1831_s7 = sld [smem:[#allocation5 + $0xd]]  ;;  %p257_p7 = scmp.gt.s32.totalorder %s962_s0, 0 }
  0xae   :  { %p963_p8 = scmp.lt.s32.totalorder %s962_s0, 63  ;;  %s1620_s8 = smov [#allocation2 + $0xc]  }
  0xaf   :  { %s1834_s9 = sshll.u32 %s1620_s8, 4  ;;  %s1941_s0 = smov (!%p257_p7, %s962_s0), 0  ;;  %s294_s9 = int_to_ptr.vmem [resolvable:$true] %s1834_s9 }
  0xb0   :  { %p278_p9 = scmp.gt.s32.totalorder %s1825_s5, 0  ;;  %s1943_s0 = smov (!%p963_p8, %s1941_s0), 63 }
  0xb1   :  { %s261_s14 = scalar_lea.hbm %s1908_s1, %s1943_s0  ;;  %p969_p10 = scmp.lt.s32.totalorder %s1825_s5, 63 }
  0xb2   :  { %s279_s11 = scalar_select %p278_p9, %s1825_s5, 0 }
  0xb3   :  { %s270_s10 = sshll.u32 %s261_s14, 4  ;;  %p299_p11 = scmp.gt.s32.totalorder %s1831_s7, 0  ;;  %s271_s10 = int_to_ptr.hbm [resolvable:$true] %s270_s10 }
  0xb4   :  { %s1457_s15 = sshra.s32 %s271_s10, 4  ;;  %s1458_s15 = int_to_ptr.hbm [resolvable:$true] %s1457_s15 }
  0xb5   :  { %s1459_s17 = scalar_lea.hbm %s1458_s15, 1  ;;  %p1462_p12 = scmp.lt.s32.totalorder %s1458_s15, %s1908_s1 }
  0xb6   :  { %p1460_p13 = scmp.ne.s32.totalorder %s1458_s15, %s1459_s17  ;;  %p1463_p0 = scmp.lt.s32.totalorder %s1668_s6, %s1459_s17 }
  0xb8   :  { %p1464_p1 = por %p1463_p0, %p1462_p12 }
  0xba   :  { %p1465_p2 = pnand %p1464_p1, %p1460_p13 }
  0xbc   :  { %1468 = shalt.err (!%p1465_p2)  }
  0xbd   :  { %275 = dma.hbm_to_vmem [thread:$0]  %s271_s10, 16, %s273_s4, [#allocation3] }
  0xbe   :  { %s1945_s11 = smov (!%p969_p10, %s279_s11), 63  ;;  %p975_p3 = scmp.lt.s32.totalorder %s1831_s7, 63 }
  0xbf   :  { %s300_s18 = scalar_select %p299_p11, %s1831_s7, 0 }
  0xc0   :  { %s282_s19 = scalar_lea.hbm %s1908_s1, %s1945_s11  ;;  %s1621_s22 = smov [#allocation2 + $0xd]  }
  0xc1   :  { %s291_s0 = sshll.u32 %s282_s19, 4  ;;  %s1857_s28 = sshll.u32 %s1621_s22, 4  ;;  %s292_s0 = int_to_ptr.hbm [resolvable:$true] %s291_s0  ;;  %s315_s28 = int_to_ptr.vmem [resolvable:$true] %s1857_s28 }
  0xc2   :  { %s1859_s29 = sld [smem:[#allocation5 + $0xe]]  ;;  %s1481_s30 = sshra.s32 %s292_s0, 4  ;;  %s1482_s30 = int_to_ptr.hbm [resolvable:$true] %s1481_s30 }
  0xc3   :  { %s1483_s3 = scalar_lea.hbm %s1482_s30, 1  ;;  %p1486_p5 = scmp.lt.s32.totalorder %s1482_s30, %s1908_s1 }
  0xc4   :  { %p1484_p4 = scmp.ne.s32.totalorder %s1482_s30, %s1483_s3  ;;  %p1487_p6 = scmp.lt.s32.totalorder %s1668_s6, %s1483_s3 }
  0xc6   :  { %p1488_p7 = por %p1487_p6, %p1486_p5 }
  0xc8   :  { %p1489_p8 = pnand %p1488_p7, %p1484_p4 }
  0xca   :  { %1492 = shalt.err (!%p1489_p8)  }
  0xcb   :  { %296 = dma.hbm_to_vmem [thread:$0]  %s292_s0, 16, %s294_s9, [#allocation3] }
  0xcc   :  { %s1947_s18 = smov (!%p975_p3, %s300_s18), 63  ;;  %s1869_s20 = sld [smem:[#allocation5 + $0xf]] }
  0xcd   :  { %s303_s16 = scalar_lea.hbm %s1908_s1, %s1947_s18  ;;  %s1622_s11 = smov [#allocation2 + $0xe]  }
  0xce   :  { %s312_s8 = sshll.u32 %s303_s16, 4  ;;  %s1875_s12 = sshll.u32 %s1622_s11, 4  ;;  %s313_s8 = int_to_ptr.hbm [resolvable:$true] %s312_s8  ;;  %s336_s12 = int_to_ptr.vmem [resolvable:$true] %s1875_s12 }
  0xcf   :  { %p320_p9 = scmp.gt.s32.totalorder %s1859_s29, 0  ;;  %s1505_s13 = sshra.s32 %s313_s8, 4  ;;  %s1506_s13 = int_to_ptr.hbm [resolvable:$true] %s1505_s13 }
  0xd0   :  { %s1507_s14 = scalar_lea.hbm %s1506_s13, 1  ;;  %p1510_p11 = scmp.lt.s32.totalorder %s1506_s13, %s1908_s1 }
  0xd1   :  { %p1508_p10 = scmp.ne.s32.totalorder %s1506_s13, %s1507_s14  ;;  %p1511_p13 = scmp.lt.s32.totalorder %s1668_s6, %s1507_s14 }
  0xd3   :  { %p1512_p12 = por %p1511_p13, %p1510_p11 }
  0xd5   :  { %p1513_p0 = pnand %p1512_p12, %p1508_p10 }
  0xd7   :  { %1516 = shalt.err (!%p1513_p0)  }
  0xd8   :  { %317 = dma.hbm_to_vmem [thread:$0]  %s313_s8, 16, %s315_s28, [#allocation3] }
  0xd9   :  { %s321_s10 = scalar_select %p320_p9, %s1859_s29, 0 }
  0xda   :  { %p981_p1 = scmp.lt.s32.totalorder %s1859_s29, 63  ;;  %p341_p2 = scmp.gt.s32.totalorder %s1869_s20, 0 }
  0xdb   :  { %p987_p3 = scmp.lt.s32.totalorder %s1869_s20, 63  ;;  %s1623_s25 = smov [#allocation2 + $0xf]  }
  0xdc   :  { %s1949_s10 = smov (!%p981_p1, %s321_s10), 63  ;;  %s356_s26 = sshll.u32 %s1623_s25, 4  ;;  %s357_s26 = int_to_ptr.vmem [resolvable:$true] %s356_s26 }
  0xdd   :  { %s342_s15 = scalar_select %p341_p2, %s1869_s20, 0 }
  0xde   :  { %s324_s24 = scalar_lea.hbm %s1908_s1, %s1949_s10 }
  0xdf   :  { %s333_s18 = sshll.u32 %s324_s24, 4  ;;  %s334_s18 = int_to_ptr.hbm [resolvable:$true] %s333_s18 }
  0xe0   :  { %s1529_s19 = sshra.s32 %s334_s18, 4  ;;  %s1530_s19 = int_to_ptr.hbm [resolvable:$true] %s1529_s19 }
  0xe1   :  { %s1531_s0 = scalar_lea.hbm %s1530_s19, 1  ;;  %p1534_p5 = scmp.lt.s32.totalorder %s1530_s19, %s1908_s1 }
  0xe2   :  { %p1532_p4 = scmp.ne.s32.totalorder %s1530_s19, %s1531_s0  ;;  %p1535_p6 = scmp.lt.s32.totalorder %s1668_s6, %s1531_s0 }
  0xe4   :  { %p1536_p7 = por %p1535_p6, %p1534_p5 }
  0xe6   :  { %p1537_p8 = pnand %p1536_p7, %p1532_p4 }
  0xe8   :  { %1540 = shalt.err (!%p1537_p8)  }
  0xe9   :  { %338 = dma.hbm_to_vmem [thread:$0]  %s334_s18, 16, %s336_s12, [#allocation3] }
  0xea   :  { %s1951_s15 = smov (!%p987_p3, %s342_s15), 63 }
  0xeb   :  { %s345_s3 = scalar_lea.hbm %s1908_s1, %s1951_s15 }
  0xec   :  { %s354_s4 = sshll.u32 %s345_s3, 4  ;;  %s355_s4 = int_to_ptr.hbm [resolvable:$true] %s354_s4 }
  0xed   :  { %s1553_s5 = sshra.s32 %s355_s4, 4  ;;  %s1554_s5 = int_to_ptr.hbm [resolvable:$true] %s1553_s5 }
  0xee   :  { %s1555_s21 = scalar_lea.hbm %s1554_s5, 1  ;;  %p1558_p10 = scmp.lt.s32.totalorder %s1554_s5, %s1908_s1 }
  0xef   :  { %p1556_p9 = scmp.ne.s32.totalorder %s1554_s5, %s1555_s21  ;;  %p1559_p11 = scmp.lt.s32.totalorder %s1668_s6, %s1555_s21 }
  0xf1   :  { %p1560_p13 = por %p1559_p11, %p1558_p10 }
  0xf3   :  { %p1561_p12 = pnand %p1560_p13, %p1556_p9 }
  0xf5   :  { %1564 = shalt.err (!%p1561_p12)  }
  0xf6   :  { %359 = dma.hbm_to_vmem [thread:$0]  %s355_s4, 16, %s357_s26, [#allocation3] }
  0xf7   :  { %1603 = dma.done.wait [#allocation3], 256 }
  0xf8   :  { %1604 = vsyncadd [#allocation3], 4294967040  ;;  %v725_v0 = vld [vmem:[#allocation2] sm:$0xff]  ;;  %v726_v2 = vld [vmem:[#allocation2 + $0x8] sm:$0xff]  ;;  %v1624_v4 = vmov 128.0   ;;  %s1625_s1 = smov [#allocation6]  }
  0xf9   :  { %727 = vadd.xlane.f32.xlu0 %v725_v0  ;;  %v740_v1 = vmul.f32 %v725_v0, %v725_v0  ;;  %v741_v3 = vmul.f32 %v726_v2, %v726_v2  ;;  %1175 = vrcp.f32 %v1624_v4  ;;  %s790_s6 = sshll.u32 %s1625_s1, 4  ;;  %s792_s11 = sshll.u32 %s1909_s2, 4  ;;  %s791_s6 = int_to_ptr.vmem [resolvable:$true] %s790_s6  ;;  %s793_s11 = int_to_ptr.hbm [resolvable:$true] %s792_s11 }
  0xfa   :  { %s1626_s12 = smov 128   ;;  %s1627_s13 = smov 8  }
  0xfb   :  { %742 = vadd.xlane.f32.xlu1 %v740_v1 }
  0xff   :  { %v1176_v5 = vpop.eup %1175 }
 0x100   :  { %v732_v6 = vmul.f32 128.0, %v1176_v5  ;;  %vm736_vm0 = vweird.f32 %v1176_v5 }
 0x101   :  { %729 = vadd.xlane.f32.xlu0 %v726_v2 }
 0x102   :  { %v733_v7 = vsub.f32 1.0, %v732_v6 }
 0x103   :  { %744 = vadd.xlane.f32.xlu1 %v741_v3 }
 0x104   :  { %v734_v8 = vmul.f32 %v1176_v5, %v733_v7 }
 0x106   :  { %v735_v9 = vadd.f32 %v1176_v5, %v734_v8 }
 0x108   :  { %v737_v10 = vsel %vm736_vm0, %v1176_v5, %v735_v9 }
 0x16c   :  { %v728_v11 = vpop.xlane.xlu0 %727 }
 0x16d   :  { %v738_v12 = vmul.f32 %v737_v10, %v728_v11 }
 0x16e   :  { %v743_v13 = vpop.xlane.xlu1 %742 }
 0x16f   :  { %v748_v14 = vmul.f32 %v738_v12, %v738_v12  ;;  %v746_v15 = vmul.f32 %v743_v13, %v737_v10  ;;  %v754_v34 = vsub.f32 %v725_v0, %v738_v12 }
 0x171   :  { %v750_v16 = vsub.f32 %v746_v15, %v748_v14 }
 0x173   :  { %v752_v17 = vmax.f32 %v750_v16, 0.0 }
 0x174   :  { %v730_v18 = vpop.xlane.xlu0 %729 }
 0x175   :  { %v756_v19 = vadd.f32 1e-12, %v752_v17  ;;  %v739_v20 = vmul.f32 %v737_v10, %v730_v18 }
 0x176   :  { %v745_v21 = vpop.xlane.xlu1 %744 }
 0x177   :  { %1177 = vrsqrt.f32 %v756_v19  ;;  %v749_v22 = vmul.f32 %v739_v20, %v739_v20  ;;  %v747_v23 = vmul.f32 %v745_v21, %v737_v10  ;;  %vm764_vm2 = vweird.f32 %v756_v19 }
 0x178   :  { %v755_v42 = vsub.f32 %v726_v2, %v739_v20 }
 0x179   :  { %v751_v24 = vsub.f32 %v747_v23, %v749_v22 }
 0x17b   :  { %v753_v25 = vmax.f32 %v751_v24, 0.0 }
 0x17d   :  { %v1178_v26 = vpop.eup %1177  ;;  %v757_v28 = vadd.f32 1e-12, %v753_v25 }
 0x17e   :  { %v759_v27 = vmul.f32 %v1178_v26, %v756_v19  ;;  %vm765_vm1 = vweird.f32 %v1178_v26 }
 0x17f   :  { %1179 = vrsqrt.f32 %v757_v28  ;;  %vm766_vm3 = vmor %vm764_vm2, %vm765_vm1  ;;  %vm774_vm5 = vweird.f32 %v757_v28 }
 0x180   :  { %v760_v29 = vmul.f32 %v1178_v26, %v759_v27 }
 0x182   :  { %v761_v30 = vmul.f32 0.5, %v760_v29 }
 0x184   :  { %v762_v31 = vsub.f32 1.5, %v761_v30 }
 0x185   :  { %v1180_v32 = vpop.eup %1179 }
 0x186   :  { %v763_v33 = vmul.f32 %v1178_v26, %v762_v31  ;;  %v769_v35 = vmul.f32 %v1180_v32, %v757_v28  ;;  %vm775_vm4 = vweird.f32 %v1180_v32 }
 0x187   :  { %vm776_vm6 = vmor %vm774_vm5, %vm775_vm4 }
 0x188   :  { %v767_v36 = vsel %vm766_vm3, %v1178_v26, %v763_v33  ;;  %v770_v38 = vmul.f32 %v1180_v32, %v769_v35 }
 0x189   :  { %v778_v37 = vmul.f32 %v767_v36, %v754_v34 }
 0x18a   :  { %v771_v39 = vmul.f32 0.5, %v770_v38 }
 0x18b   :  { %780 = vst [vmem:[#allocation6] sm:$0xff] %v778_v37 }
 0x18c   :  { %v772_v40 = vsub.f32 1.5, %v771_v39 }
 0x18e   :  { %v773_v41 = vmul.f32 %v1180_v32, %v772_v40 }
 0x190   :  { %v777_v43 = vsel %vm776_vm6, %v1180_v32, %v773_v41 }
 0x191   :  { %v779_v44 = vmul.f32 %v777_v43, %v755_v42 }
 0x193   :  { %781 = vst [vmem:[#allocation6 + $0x8] sm:$0xff] %v779_v44 }
 0x194   :  { %798 = dma.vmem_to_hbm [thread:$0]  %s791_s6, 256, %s793_s11, [#allocation7], %s1626_s12, %s1626_s12, %s1627_s13  }
 0x195   :  { %1605 = dma.done.wait [#allocation7], 256  }
 0x196   :  { %1606 = vsyncadd [#allocation7], 4294967040 }
 0x197   :  { %803 = vsyncpa [#allocation7], 1 }
 0x198   :  { %804 = vsyncmov [#allocation3] }
 0x19b   :  { %s805_s14 = vpop.sfrf %804 }
 0x19c   :  { %p1088_p0 = scmp.ne.s32.totalorder %s805_s14, 0 }
 0x19e   :  { %809 = shalt.err (%p1088_p0)  }
 0x19f   :  { %811 = vsyncmov [#allocation3 + $0x1] }
 0x1a2   :  { %s812_s2 = vpop.sfrf %811 }
 0x1a3   :  { %p1089_p1 = scmp.ne.s32.totalorder %s812_s2, 0 }
 0x1a5   :  { %816 = shalt.err (%p1089_p1)  }

</bundles_post_ra>
